<compile_context>
chip_gen: v7x
topology: tpu7x:2x2x1
jax: 0.10.0
libtpu: 0.0.40
codegen_flags: <defaults>
</compile_context>

<pallas_src>
import jax
import jax.numpy as jnp
from jax.experimental import pallas as pl
from jax.experimental.pallas import tpu as pltpu


# ----------------------------------------------------------------------------
# Single fused kernel: stacked BiLSTM -> conv branches -> relu -> max-pool -> fc
# ----------------------------------------------------------------------------
def fused_forward(x2d, lstm_layers, w_tap, conv_b, fc_w, fc_b, *,
                  seq_len, batch, hidden, kernel_sizes, num_filters):
    """x2d: (T*B, E) time-major flattened input (row t*B+b = (time t, batch b)).
    lstm_layers: list of (w_ih_packed (2*Cin, 8H), w_hh_packed (2H, 8H), b (1, 8H)).
    w_tap: (KMAX, 2H, nb*F) shared per-tap conv weights (zero-padded per branch).
    conv_b: (1, nb*F); fc_w: (nb*F, E); fc_b: (1, E).  Returns (B, E)."""
    T, B, H = seq_len, batch, hidden
    TB = x2d.shape[0]
    F = num_filters
    nbF = w_tap.shape[2]
    KMAX = w_tap.shape[0]
    E_out = fc_w.shape[1]
    n_layers = len(lstm_layers)
    Lmax = T - min(kernel_sizes) + 1
    for k in kernel_sizes:
        assert T - k + 1 >= 1, f"sequence length {T} shorter than kernel {k}"

    def kernel(*refs):
        x_ref = refs[0]
        layer_refs = [(refs[1 + 3 * l], refs[2 + 3 * l], refs[3 + 3 * l])
                      for l in range(n_layers)]
        base = 1 + 3 * n_layers
        wtap_ref, cb_ref, fcw_ref, fcb_ref, out_ref = refs[base:base + 5]

        # ------------------ stacked bidirectional LSTM ------------------
        h2d = x_ref[...]                                    # (TB, Cin) time-major
        for (wih_ref, whh_ref, b_ref) in layer_refs:
            # Phase 1 (off the serial path): direction-resolved gate slab.
            # xx row-slab s = [ x(time s) | x(time T-1-s) ]; packed W_ih routes
            # the first half to forward gate columns and the (time-reversed)
            # second half to backward gate columns -> one wide MXU matmul.
            xr = jnp.concatenate(
                [h2d[(T - 1 - s) * B:(T - s) * B, :] for s in range(T)], axis=0)
            xx = jnp.concatenate([h2d, xr], axis=1)          # (TB, 2*Cin)
            gx = (jnp.dot(xx, wih_ref[...],
                          preferred_element_type=jnp.float32)
                  + b_ref[...])                              # (TB, 8H)

            # Phase 2: serial recurrence; per step only one 256-wide h@W_hh
            # matmul + gate math.  Gate column groups: [f | i | o | g],
            # each group = [fwd H | bwd H], matching c/h = [fwd | bwd].
            whh = whh_ref[...]
            h = jnp.zeros((B, 2 * H), jnp.float32)
            c = jnp.zeros((B, 2 * H), jnp.float32)
            hs_f, hs_b = [], []
            for s in range(T):                               # T is small: unroll
                g = gx[s * B:(s + 1) * B, :] + jnp.dot(
                    h, whh, preferred_element_type=jnp.float32)
                f_g = jax.nn.sigmoid(g[:, 0:2 * H])
                i_g = jax.nn.sigmoid(g[:, 2 * H:4 * H])
                o_g = jax.nn.sigmoid(g[:, 4 * H:6 * H])
                g_g = jnp.tanh(g[:, 6 * H:8 * H])
                c = f_g * c + i_g * g_g
                h = o_g * jnp.tanh(c)
                hs_f.append(h[:, 0:H])                       # fwd output @ time s
                hs_b.append(h[:, H:2 * H])                   # bwd output @ time T-1-s
            # Single register-level assembly (no per-step masked stores).
            h2d = jnp.concatenate(
                [jnp.concatenate([hs_f[t], hs_b[T - 1 - t]], axis=1)
                 for t in range(T)], axis=0)                 # (TB, 2H)
            # inter-layer LSTM dropout: identity in eval mode

        # ---------- fused conv branches + ReLU + max-pool + fc ----------
        # Zero-pad time so every tap read is in-bounds; invalid tail positions
        # of the longer-kernel branch are masked out of the max below.
        pad = jnp.zeros(((KMAX - 1) * B, 2 * H), jnp.float32)
        xpad = jnp.concatenate([h2d, pad], axis=0)           # ((T+KMAX-1)*B, 2H)
        acc = jnp.broadcast_to(cb_ref[...], (Lmax * B, nbF))
        for j in range(KMAX):                                # KMAX shared taps
            acc = acc + jnp.dot(xpad[j * B:j * B + Lmax * B, :], wtap_ref[j],
                                preferred_element_type=jnp.float32)
        conv = acc.reshape(Lmax, B, nbF)
        # Per-branch validity mask (position t valid iff t <= T - k_branch).
        pos = jax.lax.broadcasted_iota(jnp.int32, (Lmax, B, nbF), 0)
        col = jax.lax.broadcasted_iota(jnp.int32, (Lmax, B, nbF), 2)
        limit = jnp.zeros((Lmax, B, nbF), jnp.int32)
        for bi, k in enumerate(kernel_sizes):
            in_branch = (col >= bi * F) & (col < (bi + 1) * F)
            limit = jnp.where(in_branch, T - k + 1, limit)
        masked = jnp.where(pos < limit, jnp.maximum(conv, 0.0), 0.0)
        pooled = jnp.max(masked, axis=0)                     # (B, nb*F)
        # nn.Dropout before fc: identity in eval mode.
        out_ref[...] = (jnp.dot(pooled, fcw_ref[...],
                                preferred_element_type=jnp.float32)
                        + fcb_ref[...])

    args = [x2d]
    in_specs = [pl.BlockSpec(x2d.shape, lambda i: (0, 0))]
    for (wih, whh, b) in lstm_layers:
        args += [wih, whh, b]
        in_specs += [pl.BlockSpec(wih.shape, lambda i: (0, 0)),
                     pl.BlockSpec(whh.shape, lambda i: (0, 0)),
                     pl.BlockSpec(b.shape, lambda i: (0, 0))]
    args += [w_tap, conv_b, fc_w, fc_b]
    in_specs += [pl.BlockSpec(w_tap.shape, lambda i: (0, 0, 0)),
                 pl.BlockSpec(conv_b.shape, lambda i: (0, 0)),
                 pl.BlockSpec(fc_w.shape, lambda i: (0, 0)),
                 pl.BlockSpec(fc_b.shape, lambda i: (0, 0))]

    return pl.pallas_call(
        kernel,
        out_shape=jax.ShapeDtypeStruct((B, E_out), jnp.float32),
        grid=(1,),
        in_specs=in_specs,
        out_specs=pl.BlockSpec((B, E_out), lambda i: (0, 0)),
        compiler_params=pltpu.CompilerParams(
            dimension_semantics=("arbitrary",)),
    )(*args)


# ----------------------------------------------------------------------------
# Full forward pass (inference / eval mode).
# ----------------------------------------------------------------------------
def anomaly_detector_forward(x_bte, params):
    """x_bte: (B, T, E) batch-first, like PyTorch's sequence_embeddings."""
    B, T, E = x_bte.shape
    # Single tiny relayout to time-major; everything downstream is one kernel.
    x2d = jnp.transpose(x_bte, (1, 0, 2)).reshape(T * B, E)
    return fused_forward(
        x2d, params["lstm_layers"], params["w_tap"], params["conv_b"],
        params["fc_w"], params["fc_b"],
        seq_len=T, batch=B, hidden=params["hidden_dim"],
        kernel_sizes=params["kernel_sizes"], num_filters=params["num_filters"])


# ----------------------------------------------------------------------------
# Parameters: PyTorch-style per-direction weights, plus fused/packed versions.
# ----------------------------------------------------------------------------
def make_raw_params(key, embedding_dim, hidden_dim, num_layers, kernel_sizes,
                    num_filters):
    def uniform(k, shape, scale):
        return jax.random.uniform(k, shape, jnp.float32, -scale, scale)

    raw = {"lstm_layers": [], "convs": []}
    s_lstm = 1.0 / jnp.sqrt(hidden_dim)
    for layer in range(num_layers):
        cin = embedding_dim if layer == 0 else 2 * hidden_dim
        dir_params = []
        for _direction in range(2):
            key, k1, k2, k3, k4 = jax.random.split(key, 5)
            w_ih = uniform(k1, (cin, 4 * hidden_dim), s_lstm)   # torch W_ih.T
            w_hh = uniform(k2, (hidden_dim, 4 * hidden_dim), s_lstm)
            b = (uniform(k3, (1, 4 * hidden_dim), s_lstm)
                 + uniform(k4, (1, 4 * hidden_dim), s_lstm))    # b_ih + b_hh
            dir_params.extend([w_ih, w_hh, b])
        raw["lstm_layers"].append(tuple(dir_params))

    c_in = 2 * hidden_dim
    for ks in kernel_sizes:
        key, k1, k2 = jax.random.split(key, 3)
        s_conv = 1.0 / jnp.sqrt(c_in * ks)
        w = uniform(k1, (ks, c_in, num_filters), s_conv)        # (k, C, F)
        b = uniform(k2, (1, num_filters), s_conv)
        raw["convs"].append((ks, w, b))

    fc_in = num_filters * len(kernel_sizes)
    key, k1, k2 = jax.random.split(key, 3)
    s_fc = 1.0 / jnp.sqrt(fc_in)
    raw["fc_w"] = uniform(k1, (fc_in, embedding_dim), s_fc)     # torch W.T
    raw["fc_b"] = uniform(k2, (1, embedding_dim), s_fc)
    return raw


def fuse_params(raw, hidden_dim, kernel_sizes, num_filters):
    """Pack weights into the fused kernel layout.
    LSTM gate columns: groups [f | i | o | g], each group [fwd H | bwd H];
    W_ih is (2*Cin, 8H) block-structured so the doubled input [x_t | x_{T-1-t}]
    yields a direction-resolved gate slab in one matmul; W_hh is (2H, 8H)
    block-diagonal per direction.  Conv taps are concatenated across branches
    into (KMAX, 2H, nb*F) with zero-padded taps for shorter kernels."""
    H = hidden_dim
    G = 8 * H
    F = num_filters
    nb = len(kernel_sizes)
    KMAX = max(kernel_sizes)
    GATE_SRC = (1, 0, 3, 2)   # fused group order (f,i,o,g) -> raw index in (i,f,g,o)

    fused = {"hidden_dim": H, "kernel_sizes": tuple(kernel_sizes),
             "num_filters": F, "lstm_layers": [],
             "fc_w": raw["fc_w"], "fc_b": raw["fc_b"]}

    for (wih_f, whh_f, b_f, wih_b, whh_b, b_b) in raw["lstm_layers"]:
        cin = wih_f.shape[0]
        w_ih = jnp.zeros((2 * cin, G), jnp.float32)
        w_hh = jnp.zeros((2 * H, G), jnp.float32)
        b = jnp.zeros((1, G), jnp.float32)
        for p, r in enumerate(GATE_SRC):
            src = slice(r * H, (r + 1) * H)
            cf = slice(2 * p * H, (2 * p + 1) * H)         # fwd columns, group p
            cb = slice((2 * p + 1) * H, (2 * p + 2) * H)   # bwd columns, group p
            w_ih = (w_ih.at[0:cin, cf].set(wih_f[:, src])
                         .at[cin:2 * cin, cb].set(wih_b[:, src]))
            w_hh = (w_hh.at[0:H, cf].set(whh_f[:, src])
                         .at[H:2 * H, cb].set(whh_b[:, src]))
            b = b.at[:, cf].set(b_f[:, src]).at[:, cb].set(b_b[:, src])
        fused["lstm_layers"].append((w_ih, w_hh, b))

    w_tap = jnp.zeros((KMAX, 2 * H, nb * F), jnp.float32)
    conv_b = jnp.zeros((1, nb * F), jnp.float32)
    for bi, (k, w_kcf, b_c) in enumerate(raw["convs"]):
        w_tap = w_tap.at[0:k, :, bi * F:(bi + 1) * F].set(w_kcf)
        conv_b = conv_b.at[:, bi * F:(bi + 1) * F].set(b_c)
    fused["w_tap"] = w_tap
    fused["conv_b"] = conv_b
    return fused


# ----------------------------------------------------------------------------
# Pure-JAX reference (eval mode) for a correctness check.
# ----------------------------------------------------------------------------
def reference_forward(x_bte, raw):
    B, T, _ = x_bte.shape
    h = x_bte
    for (wih_f, whh_f, b_f, wih_b, whh_b, b_b) in raw["lstm_layers"]:
        H = whh_f.shape[0]

        def run_dir(xs, wih, whh, b):
            def step(carry, x_t):
                h_prev, c_prev = carry
                gates = x_t @ wih + h_prev @ whh + b
                i = jax.nn.sigmoid(gates[:, 0:H])
                f = jax.nn.sigmoid(gates[:, H:2 * H])
                g = jnp.tanh(gates[:, 2 * H:3 * H])
                o = jax.nn.sigmoid(gates[:, 3 * H:4 * H])
                c = f * c_prev + i * g
                h_t = o * jnp.tanh(c)
                return (h_t, c), h_t

            init = (jnp.zeros((B, H), jnp.float32),
                    jnp.zeros((B, H), jnp.float32))
            _, hs = jax.lax.scan(step, init, xs)
            return hs                                        # (T, B, H)

        x_tb = jnp.transpose(h, (1, 0, 2))
        hf = run_dir(x_tb, wih_f, whh_f, b_f)
        hb = jnp.flip(run_dir(jnp.flip(x_tb, 0), wih_b, whh_b, b_b), 0)
        h = jnp.transpose(jnp.concatenate([hf, hb], axis=-1), (1, 0, 2))
    pooled = []
    for (k, w_kcf, b_c) in raw["convs"]:
        Lout = T - k + 1
        cols = []
        for t in range(Lout):
            acc = jnp.broadcast_to(b_c, (B, b_c.shape[1]))
            for j in range(k):
                acc = acc + h[:, t + j, :] @ w_kcf[j]
            cols.append(acc)
        conv = jnp.stack(cols, axis=1)                       # (B, Lout, F)
        pooled.append(jnp.max(jax.nn.relu(conv), axis=1))
    feats = jnp.concatenate(pooled, axis=1)
    return feats @ raw["fc_w"] + raw["fc_b"]


if __name__ == "__main__":
    embedding_dim = 32
    hidden_dim = 32
    num_layers = 1
    dropout = 0.1          # identity at inference
    kernel_sizes = (3, 5)
    num_filters = 16
    batch, seq = 2, 8

    key = jax.random.PRNGKey(0)
    key, kp, kx = jax.random.split(key, 3)
    raw = make_raw_params(kp, embedding_dim, hidden_dim, num_layers,
                          kernel_sizes, num_filters)
    params = fuse_params(raw, hidden_dim, kernel_sizes, num_filters)
    x = jax.random.normal(kx, (batch, seq, embedding_dim), jnp.float32)

    y = anomaly_detector_forward(x, params)
    y = jax.block_until_ready(y)
    assert y.shape == (batch, embedding_dim), y.shape
    assert bool(jnp.all(jnp.isfinite(y)))

    y_ref = reference_forward(x, raw)
    err = float(jnp.max(jnp.abs(y - y_ref)))
    assert err < 1e-3, f"mismatch vs pure-JAX reference: max abs err {err}"
    print("KERNEL_OK")
</pallas_src>

<mosaic_0001>
module attributes {stable_mosaic.version = 11 : i64} {
  func.func @kernel(%arg0: i32, %arg1: memref<16x32xf32, #tpu.memory_space<vmem>>, %arg2: memref<64x256xf32, #tpu.memory_space<vmem>>, %arg3: memref<64x256xf32, #tpu.memory_space<vmem>>, %arg4: memref<1x256xf32, #tpu.memory_space<vmem>>, %arg5: memref<5x64x32xf32, #tpu.memory_space<vmem>>, %arg6: memref<1x32xf32, #tpu.memory_space<vmem>>, %arg7: memref<32x32xf32, #tpu.memory_space<vmem>>, %arg8: memref<1x32xf32, #tpu.memory_space<vmem>>, %arg9: memref<2x32xf32, #tpu.memory_space<vmem>>) attributes {dimension_semantics = [#tpu.dimension_semantics<arbitrary>], iteration_bounds = array<i64: 1>, scalar_prefetch = 0 : i64, scratch_operands = 0 : i64, tpu.core_type = #tpu.core_type<tc>, window_params = [{pipeline_mode = #tpu.pipeline_mode<synchronous>, transform_indices = @transform_0, window_bounds = array<i64: 16, 32>}, {pipeline_mode = #tpu.pipeline_mode<synchronous>, transform_indices = @transform_1, window_bounds = array<i64: 64, 256>}, {pipeline_mode = #tpu.pipeline_mode<synchronous>, transform_indices = @transform_2, window_bounds = array<i64: 64, 256>}, {pipeline_mode = #tpu.pipeline_mode<synchronous>, transform_indices = @transform_3, window_bounds = array<i64: 1, 256>}, {pipeline_mode = #tpu.pipeline_mode<synchronous>, transform_indices = @transform_4, window_bounds = array<i64: 5, 64, 32>}, {pipeline_mode = #tpu.pipeline_mode<synchronous>, transform_indices = @transform_5, window_bounds = array<i64: 1, 32>}, {pipeline_mode = #tpu.pipeline_mode<synchronous>, transform_indices = @transform_6, window_bounds = array<i64: 32, 32>}, {pipeline_mode = #tpu.pipeline_mode<synchronous>, transform_indices = @transform_7, window_bounds = array<i64: 1, 32>}, {pipeline_mode = #tpu.pipeline_mode<synchronous>, transform_indices = @transform_8, window_bounds = array<i64: 2, 32>}]} {
    %c0 = arith.constant 0 : index
    %c0_0 = arith.constant 0 : index
    %0 = vector.load %arg1[%c0, %c0_0] : memref<16x32xf32, #tpu.memory_space<vmem>>, vector<16x32xf32>
    %1 = vector.extract_strided_slice %0 {offsets = [14, 0], sizes = [2, 32], strides = [1, 1]} : vector<16x32xf32> to vector<2x32xf32>
    %2 = vector.extract_strided_slice %0 {offsets = [12, 0], sizes = [2, 32], strides = [1, 1]} : vector<16x32xf32> to vector<2x32xf32>
    %3 = vector.extract_strided_slice %0 {offsets = [10, 0], sizes = [2, 32], strides = [1, 1]} : vector<16x32xf32> to vector<2x32xf32>
    %4 = vector.extract_strided_slice %0 {offsets = [8, 0], sizes = [2, 32], strides = [1, 1]} : vector<16x32xf32> to vector<2x32xf32>
    %5 = vector.extract_strided_slice %0 {offsets = [6, 0], sizes = [2, 32], strides = [1, 1]} : vector<16x32xf32> to vector<2x32xf32>
    %6 = vector.extract_strided_slice %0 {offsets = [4, 0], sizes = [2, 32], strides = [1, 1]} : vector<16x32xf32> to vector<2x32xf32>
    %7 = vector.extract_strided_slice %0 {offsets = [2, 0], sizes = [2, 32], strides = [1, 1]} : vector<16x32xf32> to vector<2x32xf32>
    %8 = vector.extract_strided_slice %0 {offsets = [0, 0], sizes = [2, 32], strides = [1, 1]} : vector<16x32xf32> to vector<2x32xf32>
    %9 = tpu.concatenate %1, %2, %3, %4, %5, %6, %7, %8 in 0 : vector<2x32xf32>, vector<2x32xf32>, vector<2x32xf32>, vector<2x32xf32>, vector<2x32xf32>, vector<2x32xf32>, vector<2x32xf32>, vector<2x32xf32> -> vector<16x32xf32>
    %10 = tpu.concatenate %0, %9 in 1 : vector<16x32xf32>, vector<16x32xf32> -> vector<16x64xf32>
    %c0_1 = arith.constant 0 : index
    %c0_2 = arith.constant 0 : index
    %11 = vector.load %arg2[%c0_1, %c0_2] : memref<64x256xf32, #tpu.memory_space<vmem>>, vector<64x256xf32>
    %cst = arith.constant dense<0.000000e+00> : vector<16x256xf32>
    %12 = tpu.matmul %10, %11, %cst {dimension_numbers = #tpu.dot_dimension_numbers<[1], [0], [0], [1], [0, 0, 1, 1], [], []>} : vector<16x64xf32>, vector<64x256xf32>, vector<16x256xf32> -> vector<16x256xf32>
    %c0_3 = arith.constant 0 : index
    %c0_4 = arith.constant 0 : index
    %13 = vector.load %arg4[%c0_3, %c0_4] : memref<1x256xf32, #tpu.memory_space<vmem>>, vector<1x256xf32>
    %14 = vector.broadcast %13 : vector<1x256xf32> to vector<16x256xf32>
    %15 = arith.addf %12, %14 : vector<16x256xf32>
    %c0_5 = arith.constant 0 : index
    %c0_6 = arith.constant 0 : index
    %16 = vector.load %arg3[%c0_5, %c0_6] : memref<64x256xf32, #tpu.memory_space<vmem>>, vector<64x256xf32>
    %cst_7 = arith.constant 0.000000e+00 : f32
    %17 = vector.broadcast %cst_7 : f32 to vector<2x64xf32>
    %cst_8 = arith.constant 0.000000e+00 : f32
    %18 = vector.broadcast %cst_8 : f32 to vector<2x64xf32>
    %19 = vector.extract_strided_slice %15 {offsets = [0, 0], sizes = [2, 256], strides = [1, 1]} : vector<16x256xf32> to vector<2x256xf32>
    %cst_9 = arith.constant dense<0.000000e+00> : vector<2x256xf32>
    %20 = tpu.matmul %17, %16, %cst_9 {dimension_numbers = #tpu.dot_dimension_numbers<[1], [0], [0], [1], [0, 0, 1, 1], [], []>} : vector<2x64xf32>, vector<64x256xf32>, vector<2x256xf32> -> vector<2x256xf32>
    %21 = arith.addf %19, %20 : vector<2x256xf32>
    %22 = vector.extract_strided_slice %21 {offsets = [0, 0], sizes = [2, 64], strides = [1, 1]} : vector<2x256xf32> to vector<2x64xf32>
    %23 = arith.negf %22 : vector<2x64xf32>
    %24 = math.exp %23 : vector<2x64xf32>
    %cst_10 = arith.constant 1.000000e+00 : f32
    %25 = vector.broadcast %cst_10 : f32 to vector<2x64xf32>
    %26 = arith.addf %25, %24 : vector<2x64xf32>
    %27 = arith.divf %25, %26 : vector<2x64xf32>
    %28 = vector.extract_strided_slice %21 {offsets = [0, 64], sizes = [2, 64], strides = [1, 1]} : vector<2x256xf32> to vector<2x64xf32>
    %29 = arith.negf %28 : vector<2x64xf32>
    %30 = math.exp %29 : vector<2x64xf32>
    %cst_11 = arith.constant 1.000000e+00 : f32
    %31 = vector.broadcast %cst_11 : f32 to vector<2x64xf32>
    %32 = arith.addf %31, %30 : vector<2x64xf32>
    %33 = arith.divf %31, %32 : vector<2x64xf32>
    %34 = vector.extract_strided_slice %21 {offsets = [0, 128], sizes = [2, 64], strides = [1, 1]} : vector<2x256xf32> to vector<2x64xf32>
    %35 = arith.negf %34 : vector<2x64xf32>
    %36 = math.exp %35 : vector<2x64xf32>
    %cst_12 = arith.constant 1.000000e+00 : f32
    %37 = vector.broadcast %cst_12 : f32 to vector<2x64xf32>
    %38 = arith.addf %37, %36 : vector<2x64xf32>
    %39 = arith.divf %37, %38 : vector<2x64xf32>
    %40 = vector.extract_strided_slice %21 {offsets = [0, 192], sizes = [2, 64], strides = [1, 1]} : vector<2x256xf32> to vector<2x64xf32>
    %41 = math.tanh %40 : vector<2x64xf32>
    %42 = arith.mulf %27, %18 : vector<2x64xf32>
    %43 = arith.mulf %33, %41 : vector<2x64xf32>
    %44 = arith.addf %42, %43 : vector<2x64xf32>
    %45 = math.tanh %44 : vector<2x64xf32>
    %46 = arith.mulf %39, %45 : vector<2x64xf32>
    %47 = vector.extract_strided_slice %46 {offsets = [0, 0], sizes = [2, 32], strides = [1, 1]} : vector<2x64xf32> to vector<2x32xf32>
    %48 = vector.extract_strided_slice %46 {offsets = [0, 32], sizes = [2, 32], strides = [1, 1]} : vector<2x64xf32> to vector<2x32xf32>
    %49 = vector.extract_strided_slice %15 {offsets = [2, 0], sizes = [2, 256], strides = [1, 1]} : vector<16x256xf32> to vector<2x256xf32>
    %cst_13 = arith.constant dense<0.000000e+00> : vector<2x256xf32>
    %50 = tpu.matmul %46, %16, %cst_13 {dimension_numbers = #tpu.dot_dimension_numbers<[1], [0], [0], [1], [0, 0, 1, 1], [], []>} : vector<2x64xf32>, vector<64x256xf32>, vector<2x256xf32> -> vector<2x256xf32>
    %51 = arith.addf %49, %50 : vector<2x256xf32>
    %52 = vector.extract_strided_slice %51 {offsets = [0, 0], sizes = [2, 64], strides = [1, 1]} : vector<2x256xf32> to vector<2x64xf32>
    %53 = arith.negf %52 : vector<2x64xf32>
    %54 = math.exp %53 : vector<2x64xf32>
    %cst_14 = arith.constant 1.000000e+00 : f32
    %55 = vector.broadcast %cst_14 : f32 to vector<2x64xf32>
    %56 = arith.addf %55, %54 : vector<2x64xf32>
    %57 = arith.divf %55, %56 : vector<2x64xf32>
    %58 = vector.extract_strided_slice %51 {offsets = [0, 64], sizes = [2, 64], strides = [1, 1]} : vector<2x256xf32> to vector<2x64xf32>
    %59 = arith.negf %58 : vector<2x64xf32>
    %60 = math.exp %59 : vector<2x64xf32>
    %cst_15 = arith.constant 1.000000e+00 : f32
    %61 = vector.broadcast %cst_15 : f32 to vector<2x64xf32>
    %62 = arith.addf %61, %60 : vector<2x64xf32>
    %63 = arith.divf %61, %62 : vector<2x64xf32>
    %64 = vector.extract_strided_slice %51 {offsets = [0, 128], sizes = [2, 64], strides = [1, 1]} : vector<2x256xf32> to vector<2x64xf32>
    %65 = arith.negf %64 : vector<2x64xf32>
    %66 = math.exp %65 : vector<2x64xf32>
    %cst_16 = arith.constant 1.000000e+00 : f32
    %67 = vector.broadcast %cst_16 : f32 to vector<2x64xf32>
    %68 = arith.addf %67, %66 : vector<2x64xf32>
    %69 = arith.divf %67, %68 : vector<2x64xf32>
    %70 = vector.extract_strided_slice %51 {offsets = [0, 192], sizes = [2, 64], strides = [1, 1]} : vector<2x256xf32> to vector<2x64xf32>
    %71 = math.tanh %70 : vector<2x64xf32>
    %72 = arith.mulf %57, %44 : vector<2x64xf32>
    %73 = arith.mulf %63, %71 : vector<2x64xf32>
    %74 = arith.addf %72, %73 : vector<2x64xf32>
    %75 = math.tanh %74 : vector<2x64xf32>
    %76 = arith.mulf %69, %75 : vector<2x64xf32>
    %77 = vector.extract_strided_slice %76 {offsets = [0, 0], sizes = [2, 32], strides = [1, 1]} : vector<2x64xf32> to vector<2x32xf32>
    %78 = vector.extract_strided_slice %76 {offsets = [0, 32], sizes = [2, 32], strides = [1, 1]} : vector<2x64xf32> to vector<2x32xf32>
    %79 = vector.extract_strided_slice %15 {offsets = [4, 0], sizes = [2, 256], strides = [1, 1]} : vector<16x256xf32> to vector<2x256xf32>
    %cst_17 = arith.constant dense<0.000000e+00> : vector<2x256xf32>
    %80 = tpu.matmul %76, %16, %cst_17 {dimension_numbers = #tpu.dot_dimension_numbers<[1], [0], [0], [1], [0, 0, 1, 1], [], []>} : vector<2x64xf32>, vector<64x256xf32>, vector<2x256xf32> -> vector<2x256xf32>
    %81 = arith.addf %79, %80 : vector<2x256xf32>
    %82 = vector.extract_strided_slice %81 {offsets = [0, 0], sizes = [2, 64], strides = [1, 1]} : vector<2x256xf32> to vector<2x64xf32>
    %83 = arith.negf %82 : vector<2x64xf32>
    %84 = math.exp %83 : vector<2x64xf32>
    %cst_18 = arith.constant 1.000000e+00 : f32
    %85 = vector.broadcast %cst_18 : f32 to vector<2x64xf32>
    %86 = arith.addf %85, %84 : vector<2x64xf32>
    %87 = arith.divf %85, %86 : vector<2x64xf32>
    %88 = vector.extract_strided_slice %81 {offsets = [0, 64], sizes = [2, 64], strides = [1, 1]} : vector<2x256xf32> to vector<2x64xf32>
    %89 = arith.negf %88 : vector<2x64xf32>
    %90 = math.exp %89 : vector<2x64xf32>
    %cst_19 = arith.constant 1.000000e+00 : f32
    %91 = vector.broadcast %cst_19 : f32 to vector<2x64xf32>
    %92 = arith.addf %91, %90 : vector<2x64xf32>
    %93 = arith.divf %91, %92 : vector<2x64xf32>
    %94 = vector.extract_strided_slice %81 {offsets = [0, 128], sizes = [2, 64], strides = [1, 1]} : vector<2x256xf32> to vector<2x64xf32>
    %95 = arith.negf %94 : vector<2x64xf32>
    %96 = math.exp %95 : vector<2x64xf32>
    %cst_20 = arith.constant 1.000000e+00 : f32
    %97 = vector.broadcast %cst_20 : f32 to vector<2x64xf32>
    %98 = arith.addf %97, %96 : vector<2x64xf32>
    %99 = arith.divf %97, %98 : vector<2x64xf32>
    %100 = vector.extract_strided_slice %81 {offsets = [0, 192], sizes = [2, 64], strides = [1, 1]} : vector<2x256xf32> to vector<2x64xf32>
    %101 = math.tanh %100 : vector<2x64xf32>
    %102 = arith.mulf %87, %74 : vector<2x64xf32>
    %103 = arith.mulf %93, %101 : vector<2x64xf32>
    %104 = arith.addf %102, %103 : vector<2x64xf32>
    %105 = math.tanh %104 : vector<2x64xf32>
    %106 = arith.mulf %99, %105 : vector<2x64xf32>
    %107 = vector.extract_strided_slice %106 {offsets = [0, 0], sizes = [2, 32], strides = [1, 1]} : vector<2x64xf32> to vector<2x32xf32>
    %108 = vector.extract_strided_slice %106 {offsets = [0, 32], sizes = [2, 32], strides = [1, 1]} : vector<2x64xf32> to vector<2x32xf32>
    %109 = vector.extract_strided_slice %15 {offsets = [6, 0], sizes = [2, 256], strides = [1, 1]} : vector<16x256xf32> to vector<2x256xf32>
    %cst_21 = arith.constant dense<0.000000e+00> : vector<2x256xf32>
    %110 = tpu.matmul %106, %16, %cst_21 {dimension_numbers = #tpu.dot_dimension_numbers<[1], [0], [0], [1], [0, 0, 1, 1], [], []>} : vector<2x64xf32>, vector<64x256xf32>, vector<2x256xf32> -> vector<2x256xf32>
    %111 = arith.addf %109, %110 : vector<2x256xf32>
    %112 = vector.extract_strided_slice %111 {offsets = [0, 0], sizes = [2, 64], strides = [1, 1]} : vector<2x256xf32> to vector<2x64xf32>
    %113 = arith.negf %112 : vector<2x64xf32>
    %114 = math.exp %113 : vector<2x64xf32>
    %cst_22 = arith.constant 1.000000e+00 : f32
    %115 = vector.broadcast %cst_22 : f32 to vector<2x64xf32>
    %116 = arith.addf %115, %114 : vector<2x64xf32>
    %117 = arith.divf %115, %116 : vector<2x64xf32>
    %118 = vector.extract_strided_slice %111 {offsets = [0, 64], sizes = [2, 64], strides = [1, 1]} : vector<2x256xf32> to vector<2x64xf32>
    %119 = arith.negf %118 : vector<2x64xf32>
    %120 = math.exp %119 : vector<2x64xf32>
    %cst_23 = arith.constant 1.000000e+00 : f32
    %121 = vector.broadcast %cst_23 : f32 to vector<2x64xf32>
    %122 = arith.addf %121, %120 : vector<2x64xf32>
    %123 = arith.divf %121, %122 : vector<2x64xf32>
    %124 = vector.extract_strided_slice %111 {offsets = [0, 128], sizes = [2, 64], strides = [1, 1]} : vector<2x256xf32> to vector<2x64xf32>
    %125 = arith.negf %124 : vector<2x64xf32>
    %126 = math.exp %125 : vector<2x64xf32>
    %cst_24 = arith.constant 1.000000e+00 : f32
    %127 = vector.broadcast %cst_24 : f32 to vector<2x64xf32>
    %128 = arith.addf %127, %126 : vector<2x64xf32>
    %129 = arith.divf %127, %128 : vector<2x64xf32>
    %130 = vector.extract_strided_slice %111 {offsets = [0, 192], sizes = [2, 64], strides = [1, 1]} : vector<2x256xf32> to vector<2x64xf32>
    %131 = math.tanh %130 : vector<2x64xf32>
    %132 = arith.mulf %117, %104 : vector<2x64xf32>
    %133 = arith.mulf %123, %131 : vector<2x64xf32>
    %134 = arith.addf %132, %133 : vector<2x64xf32>
    %135 = math.tanh %134 : vector<2x64xf32>
    %136 = arith.mulf %129, %135 : vector<2x64xf32>
    %137 = vector.extract_strided_slice %136 {offsets = [0, 0], sizes = [2, 32], strides = [1, 1]} : vector<2x64xf32> to vector<2x32xf32>
    %138 = vector.extract_strided_slice %136 {offsets = [0, 32], sizes = [2, 32], strides = [1, 1]} : vector<2x64xf32> to vector<2x32xf32>
    %139 = vector.extract_strided_slice %15 {offsets = [8, 0], sizes = [2, 256], strides = [1, 1]} : vector<16x256xf32> to vector<2x256xf32>
    %cst_25 = arith.constant dense<0.000000e+00> : vector<2x256xf32>
    %140 = tpu.matmul %136, %16, %cst_25 {dimension_numbers = #tpu.dot_dimension_numbers<[1], [0], [0], [1], [0, 0, 1, 1], [], []>} : vector<2x64xf32>, vector<64x256xf32>, vector<2x256xf32> -> vector<2x256xf32>
    %141 = arith.addf %139, %140 : vector<2x256xf32>
    %142 = vector.extract_strided_slice %141 {offsets = [0, 0], sizes = [2, 64], strides = [1, 1]} : vector<2x256xf32> to vector<2x64xf32>
    %143 = arith.negf %142 : vector<2x64xf32>
    %144 = math.exp %143 : vector<2x64xf32>
    %cst_26 = arith.constant 1.000000e+00 : f32
    %145 = vector.broadcast %cst_26 : f32 to vector<2x64xf32>
    %146 = arith.addf %145, %144 : vector<2x64xf32>
    %147 = arith.divf %145, %146 : vector<2x64xf32>
    %148 = vector.extract_strided_slice %141 {offsets = [0, 64], sizes = [2, 64], strides = [1, 1]} : vector<2x256xf32> to vector<2x64xf32>
    %149 = arith.negf %148 : vector<2x64xf32>
    %150 = math.exp %149 : vector<2x64xf32>
    %cst_27 = arith.constant 1.000000e+00 : f32
    %151 = vector.broadcast %cst_27 : f32 to vector<2x64xf32>
    %152 = arith.addf %151, %150 : vector<2x64xf32>
    %153 = arith.divf %151, %152 : vector<2x64xf32>
    %154 = vector.extract_strided_slice %141 {offsets = [0, 128], sizes = [2, 64], strides = [1, 1]} : vector<2x256xf32> to vector<2x64xf32>
    %155 = arith.negf %154 : vector<2x64xf32>
    %156 = math.exp %155 : vector<2x64xf32>
    %cst_28 = arith.constant 1.000000e+00 : f32
    %157 = vector.broadcast %cst_28 : f32 to vector<2x64xf32>
    %158 = arith.addf %157, %156 : vector<2x64xf32>
    %159 = arith.divf %157, %158 : vector<2x64xf32>
    %160 = vector.extract_strided_slice %141 {offsets = [0, 192], sizes = [2, 64], strides = [1, 1]} : vector<2x256xf32> to vector<2x64xf32>
    %161 = math.tanh %160 : vector<2x64xf32>
    %162 = arith.mulf %147, %134 : vector<2x64xf32>
    %163 = arith.mulf %153, %161 : vector<2x64xf32>
    %164 = arith.addf %162, %163 : vector<2x64xf32>
    %165 = math.tanh %164 : vector<2x64xf32>
    %166 = arith.mulf %159, %165 : vector<2x64xf32>
    %167 = vector.extract_strided_slice %166 {offsets = [0, 0], sizes = [2, 32], strides = [1, 1]} : vector<2x64xf32> to vector<2x32xf32>
    %168 = vector.extract_strided_slice %166 {offsets = [0, 32], sizes = [2, 32], strides = [1, 1]} : vector<2x64xf32> to vector<2x32xf32>
    %169 = vector.extract_strided_slice %15 {offsets = [10, 0], sizes = [2, 256], strides = [1, 1]} : vector<16x256xf32> to vector<2x256xf32>
    %cst_29 = arith.constant dense<0.000000e+00> : vector<2x256xf32>
    %170 = tpu.matmul %166, %16, %cst_29 {dimension_numbers = #tpu.dot_dimension_numbers<[1], [0], [0], [1], [0, 0, 1, 1], [], []>} : vector<2x64xf32>, vector<64x256xf32>, vector<2x256xf32> -> vector<2x256xf32>
    %171 = arith.addf %169, %170 : vector<2x256xf32>
    %172 = vector.extract_strided_slice %171 {offsets = [0, 0], sizes = [2, 64], strides = [1, 1]} : vector<2x256xf32> to vector<2x64xf32>
    %173 = arith.negf %172 : vector<2x64xf32>
    %174 = math.exp %173 : vector<2x64xf32>
    %cst_30 = arith.constant 1.000000e+00 : f32
    %175 = vector.broadcast %cst_30 : f32 to vector<2x64xf32>
    %176 = arith.addf %175, %174 : vector<2x64xf32>
    %177 = arith.divf %175, %176 : vector<2x64xf32>
    %178 = vector.extract_strided_slice %171 {offsets = [0, 64], sizes = [2, 64], strides = [1, 1]} : vector<2x256xf32> to vector<2x64xf32>
    %179 = arith.negf %178 : vector<2x64xf32>
    %180 = math.exp %179 : vector<2x64xf32>
    %cst_31 = arith.constant 1.000000e+00 : f32
    %181 = vector.broadcast %cst_31 : f32 to vector<2x64xf32>
    %182 = arith.addf %181, %180 : vector<2x64xf32>
    %183 = arith.divf %181, %182 : vector<2x64xf32>
    %184 = vector.extract_strided_slice %171 {offsets = [0, 128], sizes = [2, 64], strides = [1, 1]} : vector<2x256xf32> to vector<2x64xf32>
    %185 = arith.negf %184 : vector<2x64xf32>
    %186 = math.exp %185 : vector<2x64xf32>
    %cst_32 = arith.constant 1.000000e+00 : f32
    %187 = vector.broadcast %cst_32 : f32 to vector<2x64xf32>
    %188 = arith.addf %187, %186 : vector<2x64xf32>
    %189 = arith.divf %187, %188 : vector<2x64xf32>
    %190 = vector.extract_strided_slice %171 {offsets = [0, 192], sizes = [2, 64], strides = [1, 1]} : vector<2x256xf32> to vector<2x64xf32>
    %191 = math.tanh %190 : vector<2x64xf32>
    %192 = arith.mulf %177, %164 : vector<2x64xf32>
    %193 = arith.mulf %183, %191 : vector<2x64xf32>
    %194 = arith.addf %192, %193 : vector<2x64xf32>
    %195 = math.tanh %194 : vector<2x64xf32>
    %196 = arith.mulf %189, %195 : vector<2x64xf32>
    %197 = vector.extract_strided_slice %196 {offsets = [0, 0], sizes = [2, 32], strides = [1, 1]} : vector<2x64xf32> to vector<2x32xf32>
    %198 = vector.extract_strided_slice %196 {offsets = [0, 32], sizes = [2, 32], strides = [1, 1]} : vector<2x64xf32> to vector<2x32xf32>
    %199 = vector.extract_strided_slice %15 {offsets = [12, 0], sizes = [2, 256], strides = [1, 1]} : vector<16x256xf32> to vector<2x256xf32>
    %cst_33 = arith.constant dense<0.000000e+00> : vector<2x256xf32>
    %200 = tpu.matmul %196, %16, %cst_33 {dimension_numbers = #tpu.dot_dimension_numbers<[1], [0], [0], [1], [0, 0, 1, 1], [], []>} : vector<2x64xf32>, vector<64x256xf32>, vector<2x256xf32> -> vector<2x256xf32>
    %201 = arith.addf %199, %200 : vector<2x256xf32>
    %202 = vector.extract_strided_slice %201 {offsets = [0, 0], sizes = [2, 64], strides = [1, 1]} : vector<2x256xf32> to vector<2x64xf32>
    %203 = arith.negf %202 : vector<2x64xf32>
    %204 = math.exp %203 : vector<2x64xf32>
    %cst_34 = arith.constant 1.000000e+00 : f32
    %205 = vector.broadcast %cst_34 : f32 to vector<2x64xf32>
    %206 = arith.addf %205, %204 : vector<2x64xf32>
    %207 = arith.divf %205, %206 : vector<2x64xf32>
    %208 = vector.extract_strided_slice %201 {offsets = [0, 64], sizes = [2, 64], strides = [1, 1]} : vector<2x256xf32> to vector<2x64xf32>
    %209 = arith.negf %208 : vector<2x64xf32>
    %210 = math.exp %209 : vector<2x64xf32>
    %cst_35 = arith.constant 1.000000e+00 : f32
    %211 = vector.broadcast %cst_35 : f32 to vector<2x64xf32>
    %212 = arith.addf %211, %210 : vector<2x64xf32>
    %213 = arith.divf %211, %212 : vector<2x64xf32>
    %214 = vector.extract_strided_slice %201 {offsets = [0, 128], sizes = [2, 64], strides = [1, 1]} : vector<2x256xf32> to vector<2x64xf32>
    %215 = arith.negf %214 : vector<2x64xf32>
    %216 = math.exp %215 : vector<2x64xf32>
    %cst_36 = arith.constant 1.000000e+00 : f32
    %217 = vector.broadcast %cst_36 : f32 to vector<2x64xf32>
    %218 = arith.addf %217, %216 : vector<2x64xf32>
    %219 = arith.divf %217, %218 : vector<2x64xf32>
    %220 = vector.extract_strided_slice %201 {offsets = [0, 192], sizes = [2, 64], strides = [1, 1]} : vector<2x256xf32> to vector<2x64xf32>
    %221 = math.tanh %220 : vector<2x64xf32>
    %222 = arith.mulf %207, %194 : vector<2x64xf32>
    %223 = arith.mulf %213, %221 : vector<2x64xf32>
    %224 = arith.addf %222, %223 : vector<2x64xf32>
    %225 = math.tanh %224 : vector<2x64xf32>
    %226 = arith.mulf %219, %225 : vector<2x64xf32>
    %227 = vector.extract_strided_slice %226 {offsets = [0, 0], sizes = [2, 32], strides = [1, 1]} : vector<2x64xf32> to vector<2x32xf32>
    %228 = vector.extract_strided_slice %226 {offsets = [0, 32], sizes = [2, 32], strides = [1, 1]} : vector<2x64xf32> to vector<2x32xf32>
    %229 = vector.extract_strided_slice %15 {offsets = [14, 0], sizes = [2, 256], strides = [1, 1]} : vector<16x256xf32> to vector<2x256xf32>
    %cst_37 = arith.constant dense<0.000000e+00> : vector<2x256xf32>
    %230 = tpu.matmul %226, %16, %cst_37 {dimension_numbers = #tpu.dot_dimension_numbers<[1], [0], [0], [1], [0, 0, 1, 1], [], []>} : vector<2x64xf32>, vector<64x256xf32>, vector<2x256xf32> -> vector<2x256xf32>
    %231 = arith.addf %229, %230 : vector<2x256xf32>
    %232 = vector.extract_strided_slice %231 {offsets = [0, 0], sizes = [2, 64], strides = [1, 1]} : vector<2x256xf32> to vector<2x64xf32>
    %233 = arith.negf %232 : vector<2x64xf32>
    %234 = math.exp %233 : vector<2x64xf32>
    %cst_38 = arith.constant 1.000000e+00 : f32
    %235 = vector.broadcast %cst_38 : f32 to vector<2x64xf32>
    %236 = arith.addf %235, %234 : vector<2x64xf32>
    %237 = arith.divf %235, %236 : vector<2x64xf32>
    %238 = vector.extract_strided_slice %231 {offsets = [0, 64], sizes = [2, 64], strides = [1, 1]} : vector<2x256xf32> to vector<2x64xf32>
    %239 = arith.negf %238 : vector<2x64xf32>
    %240 = math.exp %239 : vector<2x64xf32>
    %cst_39 = arith.constant 1.000000e+00 : f32
    %241 = vector.broadcast %cst_39 : f32 to vector<2x64xf32>
    %242 = arith.addf %241, %240 : vector<2x64xf32>
    %243 = arith.divf %241, %242 : vector<2x64xf32>
    %244 = vector.extract_strided_slice %231 {offsets = [0, 128], sizes = [2, 64], strides = [1, 1]} : vector<2x256xf32> to vector<2x64xf32>
    %245 = arith.negf %244 : vector<2x64xf32>
    %246 = math.exp %245 : vector<2x64xf32>
    %cst_40 = arith.constant 1.000000e+00 : f32
    %247 = vector.broadcast %cst_40 : f32 to vector<2x64xf32>
    %248 = arith.addf %247, %246 : vector<2x64xf32>
    %249 = arith.divf %247, %248 : vector<2x64xf32>
    %250 = vector.extract_strided_slice %231 {offsets = [0, 192], sizes = [2, 64], strides = [1, 1]} : vector<2x256xf32> to vector<2x64xf32>
    %251 = math.tanh %250 : vector<2x64xf32>
    %252 = arith.mulf %237, %224 : vector<2x64xf32>
    %253 = arith.mulf %243, %251 : vector<2x64xf32>
    %254 = arith.addf %252, %253 : vector<2x64xf32>
    %255 = math.tanh %254 : vector<2x64xf32>
    %256 = arith.mulf %249, %255 : vector<2x64xf32>
    %257 = vector.extract_strided_slice %256 {offsets = [0, 0], sizes = [2, 32], strides = [1, 1]} : vector<2x64xf32> to vector<2x32xf32>
    %258 = vector.extract_strided_slice %256 {offsets = [0, 32], sizes = [2, 32], strides = [1, 1]} : vector<2x64xf32> to vector<2x32xf32>
    %259 = tpu.concatenate %47, %258 in 1 : vector<2x32xf32>, vector<2x32xf32> -> vector<2x64xf32>
    %260 = tpu.concatenate %77, %228 in 1 : vector<2x32xf32>, vector<2x32xf32> -> vector<2x64xf32>
    %261 = tpu.concatenate %107, %198 in 1 : vector<2x32xf32>, vector<2x32xf32> -> vector<2x64xf32>
    %262 = tpu.concatenate %137, %168 in 1 : vector<2x32xf32>, vector<2x32xf32> -> vector<2x64xf32>
    %263 = tpu.concatenate %167, %138 in 1 : vector<2x32xf32>, vector<2x32xf32> -> vector<2x64xf32>
    %264 = tpu.concatenate %197, %108 in 1 : vector<2x32xf32>, vector<2x32xf32> -> vector<2x64xf32>
    %265 = tpu.concatenate %227, %78 in 1 : vector<2x32xf32>, vector<2x32xf32> -> vector<2x64xf32>
    %266 = tpu.concatenate %257, %48 in 1 : vector<2x32xf32>, vector<2x32xf32> -> vector<2x64xf32>
    %267 = tpu.concatenate %259, %260, %261, %262, %263, %264, %265, %266 in 0 : vector<2x64xf32>, vector<2x64xf32>, vector<2x64xf32>, vector<2x64xf32>, vector<2x64xf32>, vector<2x64xf32>, vector<2x64xf32>, vector<2x64xf32> -> vector<16x64xf32>
    %cst_41 = arith.constant 0.000000e+00 : f32
    %268 = vector.broadcast %cst_41 : f32 to vector<8x64xf32>
    %269 = tpu.concatenate %267, %268 in 0 : vector<16x64xf32>, vector<8x64xf32> -> vector<24x64xf32>
    %c0_42 = arith.constant 0 : index
    %c0_43 = arith.constant 0 : index
    %270 = vector.load %arg6[%c0_42, %c0_43] : memref<1x32xf32, #tpu.memory_space<vmem>>, vector<1x32xf32>
    %271 = vector.shape_cast %270 : vector<1x32xf32> to vector<1x32xf32>
    %272 = vector.broadcast %271 : vector<1x32xf32> to vector<12x32xf32>
    %273 = vector.extract_strided_slice %269 {offsets = [0, 0], sizes = [12, 64], strides = [1, 1]} : vector<24x64xf32> to vector<12x64xf32>
    %c0_44 = arith.constant 0 : index
    %c0_45 = arith.constant 0 : index
    %c0_46 = arith.constant 0 : index
    %274 = vector.load %arg5[%c0_44, %c0_45, %c0_46] : memref<5x64x32xf32, #tpu.memory_space<vmem>>, vector<1x64x32xf32>
    %275 = vector.shape_cast %274 : vector<1x64x32xf32> to vector<64x32xf32>
    %cst_47 = arith.constant dense<0.000000e+00> : vector<12x32xf32>
    %276 = tpu.matmul %273, %275, %cst_47 {dimension_numbers = #tpu.dot_dimension_numbers<[1], [0], [0], [1], [0, 0, 1, 1], [], []>} : vector<12x64xf32>, vector<64x32xf32>, vector<12x32xf32> -> vector<12x32xf32>
    %277 = arith.addf %272, %276 : vector<12x32xf32>
    %278 = vector.extract_strided_slice %269 {offsets = [2, 0], sizes = [12, 64], strides = [1, 1]} : vector<24x64xf32> to vector<12x64xf32>
    %c1 = arith.constant 1 : index
    %c0_48 = arith.constant 0 : index
    %c0_49 = arith.constant 0 : index
    %279 = vector.load %arg5[%c1, %c0_48, %c0_49] : memref<5x64x32xf32, #tpu.memory_space<vmem>>, vector<1x64x32xf32>
    %280 = vector.shape_cast %279 : vector<1x64x32xf32> to vector<64x32xf32>
    %cst_50 = arith.constant dense<0.000000e+00> : vector<12x32xf32>
    %281 = tpu.matmul %278, %280, %cst_50 {dimension_numbers = #tpu.dot_dimension_numbers<[1], [0], [0], [1], [0, 0, 1, 1], [], []>} : vector<12x64xf32>, vector<64x32xf32>, vector<12x32xf32> -> vector<12x32xf32>
    %282 = arith.addf %277, %281 : vector<12x32xf32>
    %283 = vector.extract_strided_slice %269 {offsets = [4, 0], sizes = [12, 64], strides = [1, 1]} : vector<24x64xf32> to vector<12x64xf32>
    %c2 = arith.constant 2 : index
    %c0_51 = arith.constant 0 : index
    %c0_52 = arith.constant 0 : index
    %284 = vector.load %arg5[%c2, %c0_51, %c0_52] : memref<5x64x32xf32, #tpu.memory_space<vmem>>, vector<1x64x32xf32>
    %285 = vector.shape_cast %284 : vector<1x64x32xf32> to vector<64x32xf32>
    %cst_53 = arith.constant dense<0.000000e+00> : vector<12x32xf32>
    %286 = tpu.matmul %283, %285, %cst_53 {dimension_numbers = #tpu.dot_dimension_numbers<[1], [0], [0], [1], [0, 0, 1, 1], [], []>} : vector<12x64xf32>, vector<64x32xf32>, vector<12x32xf32> -> vector<12x32xf32>
    %287 = arith.addf %282, %286 : vector<12x32xf32>
    %288 = vector.extract_strided_slice %269 {offsets = [6, 0], sizes = [12, 64], strides = [1, 1]} : vector<24x64xf32> to vector<12x64xf32>
    %c3 = arith.constant 3 : index
    %c0_54 = arith.constant 0 : index
    %c0_55 = arith.constant 0 : index
    %289 = vector.load %arg5[%c3, %c0_54, %c0_55] : memref<5x64x32xf32, #tpu.memory_space<vmem>>, vector<1x64x32xf32>
    %290 = vector.shape_cast %289 : vector<1x64x32xf32> to vector<64x32xf32>
    %cst_56 = arith.constant dense<0.000000e+00> : vector<12x32xf32>
    %291 = tpu.matmul %288, %290, %cst_56 {dimension_numbers = #tpu.dot_dimension_numbers<[1], [0], [0], [1], [0, 0, 1, 1], [], []>} : vector<12x64xf32>, vector<64x32xf32>, vector<12x32xf32> -> vector<12x32xf32>
    %292 = arith.addf %287, %291 : vector<12x32xf32>
    %293 = vector.extract_strided_slice %269 {offsets = [8, 0], sizes = [12, 64], strides = [1, 1]} : vector<24x64xf32> to vector<12x64xf32>
    %c4 = arith.constant 4 : index
    %c0_57 = arith.constant 0 : index
    %c0_58 = arith.constant 0 : index
    %294 = vector.load %arg5[%c4, %c0_57, %c0_58] : memref<5x64x32xf32, #tpu.memory_space<vmem>>, vector<1x64x32xf32>
    %295 = vector.shape_cast %294 : vector<1x64x32xf32> to vector<64x32xf32>
    %cst_59 = arith.constant dense<0.000000e+00> : vector<12x32xf32>
    %296 = tpu.matmul %293, %295, %cst_59 {dimension_numbers = #tpu.dot_dimension_numbers<[1], [0], [0], [1], [0, 0, 1, 1], [], []>} : vector<12x64xf32>, vector<64x32xf32>, vector<12x32xf32> -> vector<12x32xf32>
    %297 = arith.addf %292, %296 : vector<12x32xf32>
    %298 = vector.shape_cast %297 : vector<12x32xf32> to vector<6x2x32xf32>
    %299 = tpu.iota {dimensions = array<i32: 0>} : vector<6x2x32xi32>
    %300 = tpu.iota {dimensions = array<i32: 2>} : vector<6x2x32xi32>
    %c0_i32 = arith.constant 0 : i32
    %301 = vector.broadcast %c0_i32 : i32 to vector<6x2x32xi32>
    %c0_i32_60 = arith.constant 0 : i32
    %302 = vector.broadcast %c0_i32_60 : i32 to vector<6x2x32xi32>
    %303 = arith.cmpi sge, %300, %302 : vector<6x2x32xi32>
    %c16_i32 = arith.constant 16 : i32
    %304 = vector.broadcast %c16_i32 : i32 to vector<6x2x32xi32>
    %305 = arith.cmpi slt, %300, %304 : vector<6x2x32xi32>
    %306 = arith.andi %303, %305 : vector<6x2x32xi1>
    %c6_i32 = arith.constant 6 : i32
    %307 = vector.broadcast %c6_i32 : i32 to vector<6x2x32xi32>
    %308 = arith.select %306, %307, %301 : vector<6x2x32xi1>, vector<6x2x32xi32>
    %c16_i32_61 = arith.constant 16 : i32
    %309 = vector.broadcast %c16_i32_61 : i32 to vector<6x2x32xi32>
    %310 = arith.cmpi sge, %300, %309 : vector<6x2x32xi32>
    %c32_i32 = arith.constant 32 : i32
    %311 = vector.broadcast %c32_i32 : i32 to vector<6x2x32xi32>
    %312 = arith.cmpi slt, %300, %311 : vector<6x2x32xi32>
    %313 = arith.andi %310, %312 : vector<6x2x32xi1>
    %c4_i32 = arith.constant 4 : i32
    %314 = vector.broadcast %c4_i32 : i32 to vector<6x2x32xi32>
    %315 = arith.select %313, %314, %308 : vector<6x2x32xi1>, vector<6x2x32xi32>
    %316 = arith.cmpi slt, %299, %315 : vector<6x2x32xi32>
    %cst_62 = arith.constant 0.000000e+00 : f32
    %317 = vector.broadcast %cst_62 : f32 to vector<6x2x32xf32>
    %318 = arith.maximumf %298, %317 : vector<6x2x32xf32>
    %cst_63 = arith.constant 0.000000e+00 : f32
    %319 = vector.broadcast %cst_63 : f32 to vector<6x2x32xf32>
    %320 = arith.select %316, %318, %319 : vector<6x2x32xi1>, vector<6x2x32xf32>
    %cst_64 = arith.constant dense<0xFF800000> : vector<2x32xf32>
    %321 = vector.multi_reduction <maximumf>, %320, %cst_64 [0] : vector<6x2x32xf32> to vector<2x32xf32>
    %c0_65 = arith.constant 0 : index
    %c0_66 = arith.constant 0 : index
    %322 = vector.load %arg7[%c0_65, %c0_66] : memref<32x32xf32, #tpu.memory_space<vmem>>, vector<32x32xf32>
    %cst_67 = arith.constant dense<0.000000e+00> : vector<2x32xf32>
    %323 = tpu.matmul %321, %322, %cst_67 {dimension_numbers = #tpu.dot_dimension_numbers<[1], [0], [0], [1], [0, 0, 1, 1], [], []>} : vector<2x32xf32>, vector<32x32xf32>, vector<2x32xf32> -> vector<2x32xf32>
    %c0_68 = arith.constant 0 : index
    %c0_69 = arith.constant 0 : index
    %324 = vector.load %arg8[%c0_68, %c0_69] : memref<1x32xf32, #tpu.memory_space<vmem>>, vector<1x32xf32>
    %325 = vector.broadcast %324 : vector<1x32xf32> to vector<2x32xf32>
    %326 = arith.addf %323, %325 : vector<2x32xf32>
    %c0_70 = arith.constant 0 : index
    %c0_71 = arith.constant 0 : index
    %327 = vector.load %arg9[%c0_70, %c0_71] : memref<2x32xf32, #tpu.memory_space<vmem>>, vector<2x32xf32>
    tpu.vector_store %arg9[%c0_70, %c0_71], %326 {strides = array<i32>} : memref<2x32xf32, #tpu.memory_space<vmem>>, vector<2x32xf32>,
    return
  }
  func.func @transform_0(%arg0: i32) -> (i32, i32) {
    %c0_i32 = arith.constant 0 : i32
    %c0_i32_0 = arith.constant 0 : i32
    %c0_i32_1 = arith.constant 0 : i32
    return %c0_i32, %c0_i32_0 : i32, i32
  }
  func.func @transform_1(%arg0: i32) -> (i32, i32) {
    %c0_i32 = arith.constant 0 : i32
    %c0_i32_0 = arith.constant 0 : i32
    %c0_i32_1 = arith.constant 0 : i32
    return %c0_i32, %c0_i32_0 : i32, i32
  }
  func.func @transform_2(%arg0: i32) -> (i32, i32) {
    %c0_i32 = arith.constant 0 : i32
    %c0_i32_0 = arith.constant 0 : i32
    %c0_i32_1 = arith.constant 0 : i32
    return %c0_i32, %c0_i32_0 : i32, i32
  }
  func.func @transform_3(%arg0: i32) -> (i32, i32) {
    %c0_i32 = arith.constant 0 : i32
    %c0_i32_0 = arith.constant 0 : i32
    %c0_i32_1 = arith.constant 0 : i32
    return %c0_i32, %c0_i32_0 : i32, i32
  }
  func.func @transform_4(%arg0: i32) -> (i32, i32, i32) {
    %c0_i32 = arith.constant 0 : i32
    %c0_i32_0 = arith.constant 0 : i32
    %c0_i32_1 = arith.constant 0 : i32
    %c0_i32_2 = arith.constant 0 : i32
    return %c0_i32, %c0_i32_0, %c0_i32_1 : i32, i32, i32
  }
  func.func @transform_5(%arg0: i32) -> (i32, i32) {
    %c0_i32 = arith.constant 0 : i32
    %c0_i32_0 = arith.constant 0 : i32
    %c0_i32_1 = arith.constant 0 : i32
    return %c0_i32, %c0_i32_0 : i32, i32
  }
  func.func @transform_6(%arg0: i32) -> (i32, i32) {
    %c0_i32 = arith.constant 0 : i32
    %c0_i32_0 = arith.constant 0 : i32
    %c0_i32_1 = arith.constant 0 : i32
    return %c0_i32, %c0_i32_0 : i32, i32
  }
  func.func @transform_7(%arg0: i32) -> (i32, i32) {
    %c0_i32 = arith.constant 0 : i32
    %c0_i32_0 = arith.constant 0 : i32
    %c0_i32_1 = arith.constant 0 : i32
    return %c0_i32, %c0_i32_0 : i32, i32
  }
  func.func @transform_8(%arg0: i32) -> (i32, i32) {
    %c0_i32 = arith.constant 0 : i32
    %c0_i32_0 = arith.constant 0 : i32
    %c0_i32_1 = arith.constant 0 : i32
    return %c0_i32, %c0_i32_0 : i32, i32
  }
}

</mosaic_0001>

<bundles_post_ra>
// kernel: tpu_custom_call.1
= control target key start
LH: loop header
LB: loop body
LE: loop exit
PB: predicated region body
PF: predicated region fallthrough
CT: control target
= control target key end

     0   :  { %vm42_vm0 = vcmask 1041408   ;;  %vm44_vm1 = vcmask 1043456   ;;  %vm46_vm2 = vcmask 1045504   ;;  %v2301_v18 = vmov 0.0   ;;  %s2302_s10 = smov 32   ;;  %s2853_s0 = inlined_call_operand.vmem [shape: f32[16,32], index: 0, kind: input, shape index: {}]   ;;  %s2854_s1 = inlined_call_operand.vmem [shape: f32[64,256], index: 1, kind: input, shape index: {}]   ;;  %s2855_s2 = inlined_call_operand.vmem [shape: f32[64,256], index: 2, kind: input, shape index: {}]   ;;  %s2856_s3 = inlined_call_operand.vmem [shape: f32[1,256], index: 3, kind: input, shape index: {}]   ;;  %s2857_s4 = inlined_call_operand.vmem [shape: f32[5,64,32], index: 4, kind: input, shape index: {}]   ;;  %s2858_s5 = inlined_call_operand.vmem [shape: f32[1,32], index: 5, kind: input, shape index: {}]   ;;  %s2859_s6 = inlined_call_operand.vmem [shape: f32[32,32], index: 6, kind: input, shape index: {}]   ;;  %s2860_s7 = inlined_call_operand.vmem [shape: f32[1,32], index: 7, kind: input, shape index: {}]   ;;  %s2861_s8 = inlined_call_operand.hbm [shape: f32[2,32], index: 8, kind: output, shape index: {}]  }
   0x1   :  { %v2357_v0 = vld [vmem:[%s2853_s0 + $0x8] sm:$0xff]  ;;  %v2362_v1 = vld [vmem:[%s2853_s0] sm:$0xff]  ;;  %v65_v7 = vld [vmem:[%s2854_s1 + $0x18] sm:$0xff]  ;;  %161 = vmatprep.mubr.f32.mxu0 %v2301_v18  ;;  %679 = vmatprep.mubr.f32.mxu1 %v2301_v18 }
   0x2   :  { %v33_v2 = vrot.slane %v2357_v0, 6  ;;  %v35_v3 = vrot.slane %v2357_v0, 2  ;;  %v38_v4 = vrot.slane %v2362_v1, 6  ;;  %v40_v5 = vrot.slane %v2362_v1, 2  ;;  %v63_v6 = vld [vmem:[%s2854_s1 + $0x8] sm:$0xff]  ;;  %v62_v9 = vld [vmem:[%s2854_s1] sm:$0xff] }
   0x3   :  { %v1933_v8 = vpack.c.bf16 %v65_v7, %v63_v6  ;;  %v64_v10 = vld [vmem:[%s2854_s1 + $0x10] sm:$0xff]  ;;  %v67_v11 = vld [vmem:[%s2854_s1 + $0x28] sm:$0xff]  ;;  %v69_v15 = vld [vmem:[%s2854_s1 + $0x38] sm:$0xff] }
   0x4   :  { %v43_v12 = vsel %vm42_vm0, %v33_v2, %v35_v3  ;;  %v48_v13 = vsel %vm42_vm0, %v38_v4, %v40_v5  ;;  %v1935_v14 = vpack.c.bf16 %v64_v10, %v62_v9  ;;  %v66_v16 = vld [vmem:[%s2854_s1 + $0x20] sm:$0xff]  ;;  %v68_v17 = vld [vmem:[%s2854_s1 + $0x30] sm:$0xff]  ;;  %v1937_v21 = vpack.c.bf16 %v69_v15, %v67_v11  ;;  %v71_v22 = vld [vmem:[%s2854_s1 + $0x48] sm:$0xff] }
   0x5   :  { %v45_v19 = vsel %vm44_vm1, %v43_v12, %v33_v2  ;;  %v49_v20 = vsel %vm44_vm1, %v48_v13, %v38_v4  ;;  %1934 = vmatprep.subr.bf16.mxu0 %v1933_v8  ;;  %v73_v23 = vld [vmem:[%s2854_s1 + $0x58] sm:$0xff]  ;;  %v1939_v25 = vpack.c.bf16 %v68_v17, %v66_v16  ;;  %v70_v26 = vld [vmem:[%s2854_s1 + $0x40] sm:$0xff]  ;;  %v72_v27 = vld [vmem:[%s2854_s1 + $0x50] sm:$0xff] }
   0x6   :  { %v47_v24 = vsel %vm46_vm2, %v45_v19, %v35_v3  ;;  %1936 = vmatpush1.bf16.msra.mxu0 %v1935_v14  ;;  %v1941_v28 = vpack.c.bf16 %v73_v23, %v71_v22  ;;  %v75_v29 = vld [vmem:[%s2854_s1 + $0x68] sm:$0xff]  ;;  %v77_v30 = vld [vmem:[%s2854_s1 + $0x78] sm:$0xff]  ;;  %v50_v32 = vsel %vm46_vm2, %v49_v20, %v40_v5  ;;  %v174_v34 = vld [vmem:[%s2855_s2] sm:$0xff]  ;;  %v1943_v38 = vpack.c.bf16 %v72_v27, %v70_v26 }
   0x7   :  { %53 = vrot.lane.b32.xlu0 %v47_v24, %s2302_s10  ;;  %1938 = vmatprep.subr.bf16.mxu0 %v1937_v21  ;;  %v175_v31 = vld [vmem:[%s2855_s2 + $0x8] sm:$0xff]  ;;  %v177_v33 = vld [vmem:[%s2855_s2 + $0x18] sm:$0xff]  ;;  %v176_v35 = vld [vmem:[%s2855_s2 + $0x10] sm:$0xff]  ;;  %v1945_v40 = vpack.c.bf16 %v77_v30, %v75_v29 }
   0x8   :  { %v179_v36 = vld [vmem:[%s2855_s2 + $0x28] sm:$0xff]  ;;  %v181_v37 = vld [vmem:[%s2855_s2 + $0x38] sm:$0xff]  ;;  %v2436_v39 = vpack.c.bf16 %v177_v33, %v175_v31  ;;  %v74_v41 = vld [vmem:[%s2854_s1 + $0x60] sm:$0xff]  ;;  %v2444_v43 = vpack.c.bf16 %v176_v35, %v174_v34 }
   0x9   :  { %v76_v42 = vld [vmem:[%s2854_s1 + $0x70] sm:$0xff]  ;;  %v2446_v44 = vpack.c.bf16 %v181_v37, %v179_v36  ;;  %v178_v45 = vld [vmem:[%s2855_s2 + $0x20] sm:$0xff]  ;;  %v183_v47 = vld [vmem:[%s2855_s2 + $0x48] sm:$0xff] }
   0xa   :  { %1940 = vmatpush1.bf16.msra.mxu0 %v1939_v25  ;;  %v180_v46 = vld [vmem:[%s2855_s2 + $0x30] sm:$0xff]  ;;  %2014 = vmatprep.subr.bf16.mxu1 %v2436_v39  ;;  %v185_v48 = vld [vmem:[%s2855_s2 + $0x58] sm:$0xff] }
   0xb   :  { %55 = vrot.lane.b32.xlu0 %v50_v32, %s2302_s10  ;;  %1942 = vmatprep.subr.bf16.mxu0 %v1941_v28 }
   0xc   :  { %2016 = vmatpush1.bf16.msra.mxu1 %v2444_v43 }
   0xd   :  { %13 = vsyncpa [#allocation3], 0  ;;  %v1947_v49 = vpack.c.bf16 %v76_v42, %v74_v41  ;;  %2018 = vmatprep.subr.bf16.mxu1 %v2446_v44  ;;  %v2463_v50 = vpack.c.bf16 %v180_v46, %v178_v45  ;;  %v2465_v51 = vpack.c.bf16 %v185_v48, %v183_v47  ;;  %v182_v52 = vld [vmem:[%s2855_s2 + $0x40] sm:$0xff]  ;;  %v184_v53 = vld [vmem:[%s2855_s2 + $0x50] sm:$0xff]  ;;  %vm59_vm3 = vcmask 261120   ;;  %s2308_s14 = smov [#allocation2]  }
   0xe   :  { %1944 = vmatpush1.bf16.msra.mxu0 %v1943_v38  ;;  %v187_v54 = vld [vmem:[%s2855_s2 + $0x68] sm:$0xff]  ;;  %v189_v55 = vld [vmem:[%s2855_s2 + $0x78] sm:$0xff]  ;;  %v2482_v56 = vpack.c.bf16 %v184_v53, %v182_v52  ;;  %v186_v58 = vld [vmem:[%s2855_s2 + $0x60] sm:$0xff]  ;;  %vm90_vm4 = vcmask 523264   ;;  %vm2305_vm5 = vmmov 0   ;;  %vm1592_vm12 = vcmask 254976  }
   0xf   :  { %1946 = vmatprep.subr.bf16.mxu0 %v1945_v40  ;;  %v2484_v57 = vpack.c.bf16 %v189_v55, %v187_v54  ;;  %v188_v59 = vld [vmem:[%s2855_s2 + $0x70] sm:$0xff]  ;;  %v78_v4 = vld [vmem:[%s2856_s3] sm:$0x3]  ;;  %s2303_s3 = smov 64   ;;  %s1695_s15 = sshll.u32 %s2308_s14, 4  ;;  %s1696_s15 = int_to_ptr.vmem [resolvable:$true] %s1695_s15 }
  0x10   :  { %2020 = vmatpush1.bf16.msra.mxu1 %v2463_v50  ;;  %v2494_v60 = vpack.c.bf16 %v188_v59, %v186_v58  ;;  %s2277_s16 = scalar_lea.vmem %s1696_s15, 32  ;;  %p2282_p1 = scmp.lt.s32.totalorder %s1696_s15, %s1696_s15 }
  0x11   :  { %2022 = vmatprep.subr.bf16.mxu1 %v2465_v51  ;;  %p2278_p0 = scmp.ne.s32.totalorder %s1696_s15, %s2277_s16  ;;  %p2283_p2 = scmp.lt.s32.totalorder %s2277_s16, %s2277_s16 }
  0x12   :  { %1948 = vmatpush1.bf16.msra.mxu0 %v1947_v49 }
  0x13   :  { %1950 = vmatprep.subr.bf16.mxu0 %v2436_v39  ;;  %p2284_p3 = por %p2283_p2, %p2282_p1 }
  0x14   :  { %2024 = vmatpush1.bf16.msra.mxu1 %v2482_v56 }
  0x15   :  { %2026 = vmatprep.subr.bf16.mxu1 %v2484_v57  ;;  %p2285_p4 = pnand %p2284_p3, %p2278_p0 }
  0x18   :  { %2028 = vmatpush1.bf16.msra.mxu1 %v2494_v60 }
  0x19   :  { %2046 = vmatprep.subr.bf16.mxu1 %v2436_v39 }
  0x79   :  { %v54_v61 = vpop.permute.xlu0 %53 }
  0x7a   :  { %v60_v62 = vsel %vm59_vm3, %v2362_v1, %v54_v61 }
  0x7b   :  { %1703 = vmatmul.mubr.msk.f32.vlgmr.msra.gmra.mrb[0].mxu0 %vm90_vm4, %v60_v62 }
  0x7c   :  { %1952 = vmatpush1.bf16.msra.mxu0 %v2444_v43  ;;  %167 = vmatprep.mubr.f32.mxu0 %v2301_v18 }
  0x7d   :  { %1954 = vmatprep.subr.bf16.mxu0 %v2446_v44  ;;  %v56_v63 = vpop.permute.xlu0 %55 }
  0x7e   :  { %v61_v2 = vsel %vm59_vm3, %v2357_v0, %v56_v63  ;;  %v80_v0 = vlaneseq }
  0x7f   :  { %1704 = vmatmul.mubr.msk.f32.gmra.mrb[2].mxu0 %vm90_vm4, %v61_v2 }
  0x80   :  { %1956 = vmatpush1.bf16.msra.mxu0 %v2463_v50  ;;  %257 = vmatprep.mubr.f32.mxu0 %v2301_v18  ;;  %v2525_v1 = vshrl.u32 %v80_v0, 7 }
  0x81   :  { %1958 = vmatprep.subr.bf16.mxu0 %v2465_v51 }
  0x82   :  { %v82_v3 = vsub.s32 0, %v2525_v1  ;;  %v86_v6 = vsub.s32 1, %v2525_v1 }
  0x84   :  { %1960 = vmatpush1.bf16.msra.mxu0 %v2482_v56  ;;  %v83_v8 = vrot.slane %v78_v4, %v82_v3  ;;  %v87_v9 = vrot.slane %v78_v4, %v86_v6 }
  0x85   :  { %1962 = vmatprep.subr.bf16.mxu0 %v2484_v57 }
  0x88   :  { %1964 = vmatpush1.bf16.msra.mxu0 %v2494_v60 }
  0x89   :  { %1966 = vmatprep.subr.bf16.mxu0 %v2436_v39 }
  0x8b   :  { %258 = vmatmul.mubr.f32.vlgmr.msra.gmra.mrb[4].mxu0 %v2301_v18 }
  0x8c   :  { %1968 = vmatpush1.bf16.msra.mxu0 %v2444_v43  ;;  %355 = vmatprep.mubr.f32.mxu0 %v2301_v18 }
  0x8d   :  { %1970 = vmatprep.subr.bf16.mxu0 %v2446_v44 }
  0x90   :  { %1972 = vmatpush1.bf16.msra.mxu0 %v2463_v50 }
  0x91   :  { %1974 = vmatprep.subr.bf16.mxu0 %v2465_v51 }
  0x94   :  { %1976 = vmatpush1.bf16.msra.mxu0 %v2482_v56 }
  0x95   :  { %1978 = vmatprep.subr.bf16.mxu0 %v2484_v57 }
  0x98   :  { %1980 = vmatpush1.bf16.msra.mxu0 %v2494_v60 }
  0x99   :  { %1982 = vmatprep.subr.bf16.mxu0 %v2436_v39 }
 0x14e   :  { %v163_v5 = vpop.f32.mrb[0].mxu0 }
 0x14f   :  { %v165_v7 = vpop.f32.mrb[1].mxu0  ;;  %v2536_v14 = vadd.f32 %v163_v5, %v83_v8 }
 0x150   :  { %v2539_v20 = vadd.f32 %v165_v7, %v87_v9 }
 0x152   :  { %v169_v10 = vpop.f32.mrb[2].mxu0 }
 0x153   :  { %v2532_v11 = vadd.f32 %v169_v10, %v83_v8  ;;  %v171_v12 = vpop.f32.mrb[3].mxu0 }
 0x154   :  { %v2534_v13 = vadd.f32 %v171_v12, %v87_v9 }
 0x15e   :  { %v259_v15 = vpop.f32.mrb[4].mxu0 }
 0x15f   :  { %v264_v16 = vadd.f32 %v259_v15, %v2536_v14  ;;  %v261_v17 = vpop.f32.mrb[5].mxu0 }
 0x160   :  { %v265_v21 = vadd.f32 %v261_v17, %v2539_v20 }
 0x161   :  { %v1705_v19 = vmul.f32 -1.442695, %v264_v16 }
 0x162   :  { %v1706_v27 = vmul.f32 -1.442695, %v265_v21 }
 0x163   :  { %2181 = vpow2.f32 %v1705_v19 }
 0x164   :  { %2183 = vtanh.f32 %v265_v21 }
 0x16d   :  { %v2182_v22 = vpop.eup %2181 }
 0x16e   :  { %v269_v23 = vadd.f32 1.0, %v2182_v22  ;;  %v2184_v24 = vpop.eup %2183 }
 0x170   :  { %2185 = vrcp.f32 %v269_v23 }
 0x171   :  { %2187 = vpow2.f32 %v1706_v27 }
 0x17a   :  { %v2186_v25 = vpop.eup %2185 }
 0x17b   :  { %v280_v26 = vmul.f32 %v2186_v25, %v2184_v24  ;;  %v2188_v28 = vpop.eup %2187  ;;  %v279_v30 = vmul.f32 0.0, %v2186_v25 }
 0x17c   :  { %v275_v29 = vadd.f32 1.0, %v2188_v28 }
 0x17d   :  { %282 = vrot.lane.b32.xlu1 %v280_v26, %s2303_s3 }
 0x17e   :  { %2189 = vrcp.f32 %v275_v29 }
 0x188   :  { %v2190_v33 = vpop.eup %2189 }
 0x1ef   :  { %v283_v31 = vpop.permute.xlu1 %282 }
 0x1f0   :  { %v285_v32 = vadd.f32 %v283_v31, %v279_v30 }
 0x1f2   :  { %2191 = vtanh.f32 %v285_v32  ;;  %v384_v49 = vrot.slane %v285_v32, 6 }
 0x1fc   :  { %v2192_v34 = vpop.eup %2191 }
 0x1fd   :  { %v2543_v35 = vmul.f32 %v2192_v34, %v2190_v33 }
 0x1ff   :  { %1707 = vmatmul.mubr.msk.f32.vlgmr.msra.gmra.mrb[6].mxu0 %vm90_vm4, %v2543_v35 }
 0x200   :  { %1984 = vmatpush1.bf16.msra.mxu0 %v2444_v43  ;;  %463 = vmatprep.mubr.f32.mxu0 %v2301_v18 }
 0x201   :  { %1986 = vmatprep.subr.bf16.mxu0 %v2446_v44 }
 0x204   :  { %1988 = vmatpush1.bf16.msra.mxu0 %v2463_v50 }
 0x205   :  { %1990 = vmatprep.subr.bf16.mxu0 %v2465_v51 }
 0x208   :  { %1992 = vmatpush1.bf16.msra.mxu0 %v2482_v56 }
 0x209   :  { %1994 = vmatprep.subr.bf16.mxu0 %v2484_v57 }
 0x20c   :  { %1996 = vmatpush1.bf16.msra.mxu0 %v2494_v60 }
 0x20d   :  { %1998 = vmatprep.subr.bf16.mxu0 %v2436_v39 }
 0x2d2   :  { %v357_v36 = vpop.f32.mrb[6].mxu0 }
 0x2d3   :  { %v364_v37 = vrot.slane %v357_v36, 6  ;;  %v359_v38 = vpop.f32.mrb[7].mxu0 }
 0x2d4   :  { %v365_v42 = vrot.slane %v359_v38, 6 }
 0x2d5   :  { %v368_v40 = vadd.f32 %v364_v37, %v2536_v14 }
 0x2d6   :  { %v369_v45 = vadd.f32 %v365_v42, %v2539_v20 }
 0x2d7   :  { %v1708_v41 = vmul.f32 -1.442695, %v368_v40 }
 0x2d8   :  { %v1709_v55 = vmul.f32 -1.442695, %v369_v45 }
 0x2d9   :  { %2193 = vpow2.f32 %v1708_v41 }
 0x2da   :  { %2195 = vtanh.f32 %v369_v45 }
 0x2e3   :  { %v2194_v46 = vpop.eup %2193 }
 0x2e4   :  { %v373_v47 = vadd.f32 1.0, %v2194_v46  ;;  %v2196_v48 = vpop.eup %2195 }
 0x2e6   :  { %2197 = vrcp.f32 %v373_v47 }
 0x2e7   :  { %2199 = vpow2.f32 %v1709_v55 }
 0x2f0   :  { %v2198_v52 = vpop.eup %2197 }
 0x2f1   :  { %v387_v53 = vmul.f32 %v2198_v52, %v2196_v48  ;;  %v386_v54 = vmul.f32 %v2198_v52, %v384_v49  ;;  %v2200_v58 = vpop.eup %2199 }
 0x2f2   :  { %v379_v59 = vadd.f32 1.0, %v2200_v58 }
 0x2f3   :  { %389 = vrot.lane.b32.xlu1 %v387_v53, %s2303_s3 }
 0x2f4   :  { %2201 = vrcp.f32 %v379_v59 }
 0x2fe   :  { %v2202_v63 = vpop.eup %2201 }
 0x365   :  { %v390_v61 = vpop.permute.xlu1 %389 }
 0x366   :  { %v392_v62 = vadd.f32 %v390_v61, %v386_v54 }
 0x368   :  { %2203 = vtanh.f32 %v392_v62  ;;  %v492_v19 = vrot.slane %v392_v62, 6 }
 0x372   :  { %v2204_v2 = vpop.eup %2203 }
 0x373   :  { %v2559_v3 = vmul.f32 %v2204_v2, %v2202_v63 }
 0x375   :  { %v396_v4 = vrot.slane %v2559_v3, 2 }
 0x377   :  { %1710 = vmatmul.mubr.msk.f32.vlgmr.msra.gmra.mrb[8].mxu0 %vm90_vm4, %v396_v4 }
 0x378   :  { %2000 = vmatpush1.bf16.msra.mxu0 %v2444_v43  ;;  %571 = vmatprep.mubr.f32.mxu0 %v2301_v18 }
 0x379   :  { %2002 = vmatprep.subr.bf16.mxu0 %v2446_v44 }
 0x37c   :  { %2004 = vmatpush1.bf16.msra.mxu0 %v2463_v50 }
 0x37d   :  { %2006 = vmatprep.subr.bf16.mxu0 %v2465_v51 }
 0x380   :  { %2008 = vmatpush1.bf16.msra.mxu0 %v2482_v56 }
 0x381   :  { %2010 = vmatprep.subr.bf16.mxu0 %v2484_v57 }
 0x384   :  { %2012 = vmatpush1.bf16.msra.mxu0 %v2494_v60 }
 0x385   :  { %2030 = vmatprep.subr.bf16.mxu0 %v2436_v39 }
 0x44a   :  { %v465_v5 = vpop.f32.mrb[8].mxu0 }
 0x44b   :  { %v472_v6 = vrot.slane %v465_v5, 4  ;;  %v467_v7 = vpop.f32.mrb[9].mxu0 }
 0x44c   :  { %v473_v10 = vrot.slane %v467_v7, 4 }
 0x44d   :  { %v476_v8 = vadd.f32 %v472_v6, %v2536_v14 }
 0x44e   :  { %v477_v12 = vadd.f32 %v473_v10, %v2539_v20 }
 0x44f   :  { %v1711_v9 = vmul.f32 -1.442695, %v476_v8 }
 0x450   :  { %v1712_v24 = vmul.f32 -1.442695, %v477_v12 }
 0x451   :  { %2205 = vpow2.f32 %v1711_v9 }
 0x452   :  { %2207 = vtanh.f32 %v477_v12 }
 0x45b   :  { %v2206_v15 = vpop.eup %2205 }
 0x45c   :  { %v481_v16 = vadd.f32 1.0, %v2206_v15  ;;  %v2208_v17 = vpop.eup %2207 }
 0x45e   :  { %2209 = vrcp.f32 %v481_v16 }
 0x45f   :  { %2211 = vpow2.f32 %v1712_v24 }
 0x468   :  { %v2210_v21 = vpop.eup %2209 }
 0x469   :  { %v495_v22 = vmul.f32 %v2210_v21, %v2208_v17  ;;  %v494_v23 = vmul.f32 %v2210_v21, %v492_v19  ;;  %v2212_v25 = vpop.eup %2211 }
 0x46a   :  { %v487_v26 = vadd.f32 1.0, %v2212_v25 }
 0x46b   :  { %497 = vrot.lane.b32.xlu0 %v495_v22, %s2303_s3 }
 0x46c   :  { %2213 = vrcp.f32 %v487_v26 }
 0x476   :  { %v2214_v29 = vpop.eup %2213 }
 0x4dd   :  { %v498_v27 = vpop.permute.xlu0 %497 }
 0x4de   :  { %v500_v28 = vadd.f32 %v498_v27, %v494_v23 }
 0x4e0   :  { %2215 = vtanh.f32 %v500_v28  ;;  %v600_v47 = vrot.slane %v500_v28, 6 }
 0x4ea   :  { %v2216_v30 = vpop.eup %2215 }
 0x4eb   :  { %v2575_v31 = vmul.f32 %v2216_v30, %v2214_v29 }
 0x4ed   :  { %v504_v32 = vrot.slane %v2575_v31, 4 }
 0x4ef   :  { %1713 = vmatmul.mubr.msk.f32.vlgmr.msra.gmra.mrb[10].mxu0 %vm90_vm4, %v504_v32 }
 0x4f0   :  { %2032 = vmatpush1.bf16.msra.mxu0 %v2444_v43  ;;  %780 = vmatprep.mubr.f32.mxu0 %v2301_v18 }
 0x4f1   :  { %2034 = vmatprep.subr.bf16.mxu0 %v2446_v44 }
 0x4f4   :  { %2036 = vmatpush1.bf16.msra.mxu0 %v2463_v50 }
 0x4f5   :  { %2038 = vmatprep.subr.bf16.mxu0 %v2465_v51 }
 0x4f8   :  { %2040 = vmatpush1.bf16.msra.mxu0 %v2482_v56 }
 0x4f9   :  { %2042 = vmatprep.subr.bf16.mxu0 %v2484_v57 }
 0x4fc   :  { %2044 = vmatpush1.bf16.msra.mxu0 %v2494_v60 }
 0x4fd   :  { %2062 = vmatprep.subr.bf16.mxu0 %v2436_v39 }
 0x5c2   :  { %v573_v33 = vpop.f32.mrb[10].mxu0 }
 0x5c3   :  { %v580_v34 = vrot.slane %v573_v33, 2  ;;  %v575_v36 = vpop.f32.mrb[11].mxu0 }
 0x5c4   :  { %v581_v40 = vrot.slane %v575_v36, 2 }
 0x5c5   :  { %v584_v37 = vadd.f32 %v580_v34, %v2536_v14 }
 0x5c6   :  { %v585_v41 = vadd.f32 %v581_v40, %v2539_v20 }
 0x5c7   :  { %v1714_v38 = vmul.f32 -1.442695, %v584_v37 }
 0x5c8   :  { %v1715_v39 = vmul.f32 -1.442695, %v585_v41 }
 0x5c9   :  { %2217 = vpow2.f32 %v1714_v38 }
 0x5ca   :  { %2219 = vtanh.f32 %v585_v41 }
 0x5d3   :  { %v2218_v42 = vpop.eup %2217 }
 0x5d4   :  { %v589_v45 = vadd.f32 1.0, %v2218_v42  ;;  %v2220_v46 = vpop.eup %2219 }
 0x5d6   :  { %2221 = vrcp.f32 %v589_v45 }
 0x5d7   :  { %2223 = vpow2.f32 %v1715_v39 }
 0x5e0   :  { %v2222_v48 = vpop.eup %2221 }
 0x5e1   :  { %v603_v49 = vmul.f32 %v2222_v48, %v2220_v46  ;;  %v602_v52 = vmul.f32 %v2222_v48, %v600_v47  ;;  %v2224_v53 = vpop.eup %2223  ;;  %v1051_v46 = vrot.slane %v2575_v31, 2 }
 0x5e2   :  { %v595_v14 = vadd.f32 1.0, %v2224_v53 }
 0x5e3   :  { %605 = vrot.lane.b32.xlu1 %v603_v49, %s2303_s3 }
 0x5e4   :  { %2225 = vrcp.f32 %v595_v14 }
 0x5ee   :  { %v2226_v20 = vpop.eup %2225 }
 0x655   :  { %v606_v54 = vpop.permute.xlu1 %605 }
 0x656   :  { %v608_v55 = vadd.f32 %v606_v54, %v602_v52 }
 0x658   :  { %2227 = vtanh.f32 %v608_v55  ;;  %v702_v9 = vrot.slane %v608_v55, 6 }
 0x662   :  { %v2228_v58 = vpop.eup %2227 }
 0x663   :  { %v2591_v59 = vmul.f32 %v2228_v58, %v2226_v20 }
 0x665   :  { %v612_v61 = vrot.slane %v2591_v59, 6 }
 0x667   :  { %1716 = vmatmul.mubr.msk.f32.vlgmr.msra.gmra.mrb[0].mxu1 %vm90_vm4, %v612_v61 }
 0x668   :  { %2048 = vmatpush1.bf16.msra.mxu1 %v2444_v43  ;;  %888 = vmatprep.mubr.f32.mxu1 %v2301_v18 }
 0x669   :  { %2050 = vmatprep.subr.bf16.mxu1 %v2446_v44 }
 0x66c   :  { %2052 = vmatpush1.bf16.msra.mxu1 %v2463_v50 }
 0x66d   :  { %2054 = vmatprep.subr.bf16.mxu1 %v2465_v51 }
 0x670   :  { %2056 = vmatpush1.bf16.msra.mxu1 %v2482_v56 }
 0x671   :  { %2058 = vmatprep.subr.bf16.mxu1 %v2484_v57 }
 0x674   :  { %2060 = vmatpush1.bf16.msra.mxu1 %v2494_v60 }
 0x73a   :  { %v681_v62 = vpop.f32.mrb[0].mxu1 }
 0x73b   :  { %v686_v63 = vadd.f32 %v681_v62, %v2532_v11  ;;  %v683_v2 = vpop.f32.mrb[1].mxu1 }
 0x73c   :  { %v687_v5 = vadd.f32 %v683_v2, %v2534_v13 }
 0x73d   :  { %v1717_v4 = vmul.f32 -1.442695, %v686_v63 }
 0x73e   :  { %v1718_v16 = vmul.f32 -1.442695, %v687_v5 }
 0x73f   :  { %2229 = vpow2.f32 %v1717_v4 }
 0x740   :  { %2231 = vtanh.f32 %v687_v5 }
 0x749   :  { %v2230_v6 = vpop.eup %2229 }
 0x74a   :  { %v691_v7 = vadd.f32 1.0, %v2230_v6  ;;  %v2232_v8 = vpop.eup %2231 }
 0x74c   :  { %2233 = vrcp.f32 %v691_v7 }
 0x74d   :  { %2235 = vpow2.f32 %v1718_v16 }
 0x756   :  { %v2234_v10 = vpop.eup %2233 }
 0x757   :  { %v705_v12 = vmul.f32 %v2234_v10, %v2232_v8  ;;  %v704_v15 = vmul.f32 %v2234_v10, %v702_v9  ;;  %v2236_v17 = vpop.eup %2235 }
 0x758   :  { %v697_v19 = vadd.f32 1.0, %v2236_v17 }
 0x759   :  { %707 = vrot.lane.b32.xlu0 %v705_v12, %s2303_s3 }
 0x75a   :  { %2237 = vrcp.f32 %v697_v19  ;;  %v1054_v19 = vrot.slane %v2559_v3, 6 }
 0x764   :  { %v2238_v23 = vpop.eup %2237 }
 0x7cb   :  { %v708_v21 = vpop.permute.xlu0 %707 }
 0x7cc   :  { %v710_v22 = vadd.f32 %v708_v21, %v704_v15 }
 0x7ce   :  { %2239 = vtanh.f32 %v710_v22 }
 0x7d8   :  { %v2240_v24 = vpop.eup %2239 }
 0x7d9   :  { %v2608_v25 = vmul.f32 %v2240_v24, %v2238_v23 }
 0x7db   :  { %1719 = vmatmul.mubr.msk.f32.vlgmr.msra.gmra.mrb[12].mxu0 %vm90_vm4, %v2608_v25  ;;  %v1050_v48 = vsel %vm59_vm3, %v2608_v25, %v612_v61 }
 0x7dc   :  { %2064 = vmatpush1.bf16.msra.mxu0 %v2444_v43  ;;  %996 = vmatprep.mubr.f32.mxu0 %v2301_v18 }
 0x7dd   :  { %2066 = vmatprep.subr.bf16.mxu0 %v2446_v44 }
 0x7e0   :  { %2068 = vmatpush1.bf16.msra.mxu0 %v2463_v50 }
 0x7e1   :  { %2070 = vmatprep.subr.bf16.mxu0 %v2465_v51 }
 0x7e4   :  { %2072 = vmatpush1.bf16.msra.mxu0 %v2482_v56  ;;  %v809_v56 = vrot.slane %v710_v22, 6 }
 0x7e5   :  { %2074 = vmatprep.subr.bf16.mxu0 %v2484_v57 }
 0x7e8   :  { %2076 = vmatpush1.bf16.msra.mxu0 %v2494_v60 }
 0x8ae   :  { %v782_v26 = vpop.f32.mrb[12].mxu0 }
 0x8af   :  { %v789_v27 = vrot.slane %v782_v26, 6  ;;  %v784_v28 = vpop.f32.mrb[13].mxu0 }
 0x8b0   :  { %v790_v30 = vrot.slane %v784_v28, 6 }
 0x8b1   :  { %v793_v29 = vadd.f32 %v789_v27, %v2532_v11 }
 0x8b2   :  { %v794_v44 = vadd.f32 %v790_v30, %v2534_v13 }
 0x8b3   :  { %v1720_v43 = vmul.f32 -1.442695, %v793_v29 }
 0x8b4   :  { %v1721_v60 = vmul.f32 -1.442695, %v794_v44 }
 0x8b5   :  { %2241 = vpow2.f32 %v1720_v43 }
 0x8b6   :  { %2243 = vtanh.f32 %v794_v44 }
 0x8bf   :  { %v2242_v32 = vpop.eup %2241 }
 0x8c0   :  { %v798_v50 = vadd.f32 1.0, %v2242_v32  ;;  %v2244_v51 = vpop.eup %2243 }
 0x8c2   :  { %2245 = vrcp.f32 %v798_v50  ;;  %v1073_v50 = vld [vmem:[%s2857_s4] sm:$0xff] }
 0x8c3   :  { %2247 = vpow2.f32 %v1721_v60 }
 0x8cc   :  { %v2246_v33 = vpop.eup %2245 }
 0x8cd   :  { %v812_v57 = vmul.f32 %v2246_v33, %v2244_v51  ;;  %v811_v34 = vmul.f32 %v2246_v33, %v809_v56  ;;  %v2248_v36 = vpop.eup %2247  ;;  %v1074_v51 = vld [vmem:[%s2857_s4 + $0x8] sm:$0xff] }
 0x8ce   :  { %v804_v37 = vadd.f32 1.0, %v2248_v36  ;;  %v2077_v56 = vpack.c.bf16 %v1074_v51, %v1073_v50  ;;  %v1077_v36 = vld [vmem:[%s2857_s4 + $0x20] sm:$0xff]  ;;  %v1742_v50 = vld [vmem:[%s2857_s4 + $0x88] sm:$0xff] }
 0x8cf   :  { %814 = vrot.lane.b32.xlu1 %v812_v57, %s2303_s3 }
 0x8d0   :  { %2249 = vrcp.f32 %v804_v37  ;;  %2078 = vmatprep.subr.bf16.mxu1 %v2077_v56  ;;  %v1078_v37 = vld [vmem:[%s2857_s4 + $0x28] sm:$0xff] }
 0x8da   :  { %v2250_v41 = vpop.eup %2249 }
 0x941   :  { %v815_v38 = vpop.permute.xlu1 %814 }
 0x942   :  { %v817_v40 = vadd.f32 %v815_v38, %v811_v34 }
 0x944   :  { %2251 = vtanh.f32 %v817_v40  ;;  %v917_v2 = vrot.slane %v817_v40, 6 }
 0x94e   :  { %v2252_v42 = vpop.eup %2251 }
 0x94f   :  { %v2623_v45 = vmul.f32 %v2252_v42, %v2250_v41  ;;  %v2085_v41 = vpack.c.bf16 %v1078_v37, %v1077_v36  ;;  %v1079_v42 = vld [vmem:[%s2857_s4 + $0x30] sm:$0xff]  ;;  %v1748_v36 = vld [vmem:[%s2857_s4 + $0xb8] sm:$0xff] }
 0x951   :  { %v821_v47 = vrot.slane %v2623_v45, 2  ;;  %v1053_v49 = vsel %vm59_vm3, %v2623_v45, %v1051_v46  ;;  %v1080_v46 = vld [vmem:[%s2857_s4 + $0x38] sm:$0xff] }
 0x952   :  { %v1063_v52 = vsel %vm42_vm0, %v1050_v48, %v1053_v49  ;;  %v1731_v48 = vld [vmem:[%s2857_s4 + $0x40] sm:$0xff]  ;;  %v1732_v49 = vld [vmem:[%s2857_s4 + $0x48] sm:$0xff] }
 0x953   :  { %1722 = vmatmul.mubr.msk.f32.vlgmr.msra.gmra.mrb[2].mxu1 %vm90_vm4, %v821_v47  ;;  %v2089_v47 = vpack.c.bf16 %v1080_v46, %v1079_v42  ;;  %v1753_v42 = vld [vmem:[%s2857_s4 + $0xd0] sm:$0xff]  ;;  %v1754_v46 = vld [vmem:[%s2857_s4 + $0xd8] sm:$0xff] }
 0x954   :  { %2080 = vmatpush3.bf16.msra.mxu1 %v2077_v56  ;;  %v1743_v56 = vld [vmem:[%s2857_s4 + $0x90] sm:$0xff] }
 0xa26   :  { %v890_v39 = vpop.f32.mrb[2].mxu1 }
 0xa27   :  { %v897_v53 = vrot.slane %v890_v39, 4  ;;  %v892_v14 = vpop.f32.mrb[3].mxu1 }
 0xa28   :  { %v898_v20 = vrot.slane %v892_v14, 4 }
 0xa29   :  { %v901_v54 = vadd.f32 %v897_v53, %v2532_v11 }
 0xa2a   :  { %v902_v58 = vadd.f32 %v898_v20, %v2534_v13 }
 0xa2b   :  { %v1723_v55 = vmul.f32 -1.442695, %v901_v54 }
 0xa2c   :  { %v1724_v7 = vmul.f32 -1.442695, %v902_v58 }
 0xa2d   :  { %2253 = vpow2.f32 %v1723_v55 }
 0xa2e   :  { %2255 = vtanh.f32 %v902_v58 }
 0xa37   :  { %v2254_v62 = vpop.eup %2253 }
 0xa38   :  { %v906_v63 = vadd.f32 1.0, %v2254_v62  ;;  %v2256_v61 = vpop.eup %2255 }
 0xa3a   :  { %2257 = vrcp.f32 %v906_v63 }
 0xa3b   :  { %2259 = vpow2.f32 %v1724_v7 }
 0xa44   :  { %v2258_v4 = vpop.eup %2257 }
 0xa45   :  { %v920_v5 = vmul.f32 %v2258_v4, %v2256_v61  ;;  %v919_v6 = vmul.f32 %v2258_v4, %v917_v2  ;;  %v2260_v8 = vpop.eup %2259  ;;  %v1057_v61 = vrot.slane %v2543_v35, 2  ;;  %v1043_v2 = vrot.slane %v2623_v45, 6  ;;  %v1734_v45 = vld [vmem:[%s2857_s4 + $0x58] sm:$0xff] }
 0xa46   :  { %v912_v9 = vadd.f32 1.0, %v2260_v8 }
 0xa47   :  { %922 = vrot.lane.b32.xlu0 %v920_v5, %s2303_s3  ;;  %v1046_v5 = vrot.slane %v2608_v25, 2  ;;  %v1045_v25 = vsel %vm59_vm3, %v2575_v31, %v1043_v2  ;;  %v1735_v31 = vld [vmem:[%s2857_s4 + $0x60] sm:$0xff] }
 0xa48   :  { %2261 = vrcp.f32 %v912_v9 }
 0xa52   :  { %v2262_v15 = vpop.eup %2261 }
 0xab9   :  { %v923_v10 = vpop.permute.xlu0 %922 }
 0xaba   :  { %v925_v12 = vadd.f32 %v923_v10, %v919_v6  ;;  %v1733_v10 = vld [vmem:[%s2857_s4 + $0x50] sm:$0xff] }
 0xabc   :  { %2263 = vtanh.f32 %v925_v12  ;;  %v1025_v34 = vrot.slane %v925_v12, 6 }
 0xac6   :  { %v2264_v16 = vpop.eup %2263 }
 0xac7   :  { %v2638_v17 = vmul.f32 %v2264_v16, %v2262_v15  ;;  %v1048_v15 = vsel %vm59_vm3, %v2591_v59, %v1046_v5  ;;  %v1736_v59 = vld [vmem:[%s2857_s4 + $0x68] sm:$0xff] }
 0xac8   :  { %v1766_v5 = vld [vmem:[%s2857_s4 + $0x128] sm:$0xff] }
 0xac9   :  { %v929_v21 = vrot.slane %v2638_v17, 4  ;;  %v1056_v22 = vsel %vm59_vm3, %v2638_v17, %v1054_v19  ;;  %v1040_v63 = vrot.slane %v2638_v17, 2  ;;  %v2097_v17 = vpack.c.bf16 %v1734_v45, %v1733_v10  ;;  %v1605_v45 = vld [vmem:[%s2859_s6 + $0x8] sm:$0xff] }
 0xaca   :  { %v1064_v23 = vsel %vm44_vm1, %v1063_v52, %v1056_v22  ;;  %v2093_v52 = vpack.c.bf16 %v1732_v49, %v1731_v48  ;;  %v1755_v48 = vld [vmem:[%s2857_s4 + $0xe0] sm:$0xff]  ;;  %v1756_v49 = vld [vmem:[%s2857_s4 + $0xe8] sm:$0xff] }
 0xacb   :  { %1725 = vmatmul.mubr.msk.f32.vlgmr.msra.gmra.mrb[14].mxu0 %vm90_vm4, %v929_v21  ;;  %v1042_v9 = vsel %vm59_vm3, %v2559_v3, %v1040_v63  ;;  %v1764_v63 = vld [vmem:[%s2857_s4 + $0x118] sm:$0xff] }
 0xacc   :  { %1930 = vmatprep.mubr.msk.f32.mxu0 %vm2305_vm5, %v2301_v18 }
 0xb9e   :  { %v998_v24 = vpop.f32.mrb[14].mxu0 }
 0xb9f   :  { %v1005_v26 = vrot.slane %v998_v24, 2  ;;  %v1000_v27 = vpop.f32.mrb[15].mxu0 }
 0xba0   :  { %v1006_v43 = vrot.slane %v1000_v27, 2 }
 0xba1   :  { %v1009_v28 = vadd.f32 %v1005_v26, %v2532_v11  ;;  %v1075_v11 = vld [vmem:[%s2857_s4 + $0x10] sm:$0xff] }
 0xba2   :  { %v1010_v30 = vadd.f32 %v1006_v43, %v2534_v13  ;;  %v1076_v13 = vld [vmem:[%s2857_s4 + $0x18] sm:$0xff]  ;;  %v1737_v43 = vld [vmem:[%s2857_s4 + $0x70] sm:$0xff] }
 0xba3   :  { %v1726_v29 = vmul.f32 -1.442695, %v1009_v28  ;;  %v2081_v33 = vpack.c.bf16 %v1076_v13, %v1075_v11  ;;  %v1744_v11 = vld [vmem:[%s2857_s4 + $0x98] sm:$0xff] }
 0xba4   :  { %v1727_v39 = vmul.f32 -1.442695, %v1010_v30  ;;  %v2113_v13 = vpack.c.bf16 %v1744_v11, %v1743_v56 }
 0xba5   :  { %2265 = vpow2.f32 %v1726_v29  ;;  %2082 = vmatprep.subr.bf16.mxu1 %v2081_v33  ;;  %v2101_v29 = vpack.c.bf16 %v1736_v59, %v1735_v31 }
 0xba6   :  { %2267 = vtanh.f32 %v1010_v30  ;;  %2084 = vmatpush3.bf16.msra.mxu1 %v2081_v33  ;;  %v1738_v30 = vld [vmem:[%s2857_s4 + $0x78] sm:$0xff]  ;;  %v1745_v33 = vld [vmem:[%s2857_s4 + $0xa0] sm:$0xff] }
 0xba7   :  { %2086 = vmatprep.subr.bf16.mxu1 %v2085_v41 }
 0xbaa   :  { %2088 = vmatpush3.bf16.msra.mxu1 %v2085_v41 }
 0xbab   :  { %2090 = vmatprep.subr.bf16.mxu1 %v2089_v47 }
 0xbae   :  { %2092 = vmatpush3.bf16.msra.mxu1 %v2089_v47  ;;  %v2129_v47 = vpack.c.bf16 %v1754_v46, %v1753_v42 }
 0xbaf   :  { %v2266_v44 = vpop.eup %2265  ;;  %2094 = vmatprep.subr.bf16.mxu1 %v2093_v52 }
 0xbb0   :  { %v1014_v32 = vadd.f32 1.0, %v2266_v44  ;;  %v2268_v57 = vpop.eup %2267  ;;  %v2105_v44 = vpack.c.bf16 %v1738_v30, %v1737_v43 }
 0xbb2   :  { %2269 = vrcp.f32 %v1014_v32  ;;  %v1741_v32 = vld [vmem:[%s2857_s4 + $0x80] sm:$0xff] }
 0xbb3   :  { %2271 = vpow2.f32 %v1727_v39  ;;  %v2109_v51 = vpack.c.bf16 %v1742_v50, %v1741_v32  ;;  %v1757_v39 = vld [vmem:[%s2857_s4 + $0xf0] sm:$0xff] }
 0xbbc   :  { %v2270_v60 = vpop.eup %2269 }
 0xbbd   :  { %v1028_v38 = vmul.f32 %v2270_v60, %v2268_v57  ;;  %v1027_v40 = vmul.f32 %v2270_v60, %v1025_v34  ;;  %v2272_v53 = vpop.eup %2271  ;;  %v1746_v57 = vld [vmem:[%s2857_s4 + $0xa8] sm:$0xff]  ;;  %v1747_v60 = vld [vmem:[%s2857_s4 + $0xb0] sm:$0xff] }
 0xbbe   :  { %v1020_v14 = vadd.f32 1.0, %v2272_v53  ;;  %v2117_v34 = vpack.c.bf16 %v1746_v57, %v1745_v33  ;;  %v2121_v37 = vpack.c.bf16 %v1748_v36, %v1747_v60  ;;  %v1758_v53 = vld [vmem:[%s2857_s4 + $0xf8] sm:$0xff] }
 0xbbf   :  { %1030 = vrot.lane.b32.xlu1 %v1028_v38, %s2303_s3  ;;  %v1751_v38 = vld [vmem:[%s2857_s4 + $0xc0] sm:$0xff] }
 0xbc0   :  { %2273 = vrcp.f32 %v1020_v14  ;;  %v2137_v14 = vpack.c.bf16 %v1758_v53, %v1757_v39 }
 0xbca   :  { %v2274_v20 = vpop.eup %2273 }
 0xc31   :  { %v1031_v54 = vpop.permute.xlu1 %1030 }
 0xc32   :  { %v1033_v55 = vadd.f32 %v1031_v54, %v1027_v40  ;;  %v1752_v40 = vld [vmem:[%s2857_s4 + $0xc8] sm:$0xff]  ;;  %v1761_v54 = vld [vmem:[%s2857_s4 + $0x100] sm:$0xff] }
 0xc33   :  { %v2125_v41 = vpack.c.bf16 %v1752_v40, %v1751_v38 }
 0xc34   :  { %2275 = vtanh.f32 %v1033_v55  ;;  %v1762_v55 = vld [vmem:[%s2857_s4 + $0x108] sm:$0xff] }
 0xc3e   :  { %v2276_v58 = vpop.eup %2275 }
 0xc3f   :  { %v1035_v62 = vmul.f32 %v2276_v58, %v2274_v20  ;;  %v2141_v20 = vpack.c.bf16 %v1762_v55, %v1761_v54  ;;  %v1362_v58 = vrot.slane %v2301_v18, 6  ;;  %v1770_v54 = vld [vmem:[%s2860_s7] ss:$0 sm:$0xff] }
 0xc41   :  { %v1037_v4 = vrot.slane %v1035_v62, 6  ;;  %v1059_v6 = vsel %vm59_vm3, %v1035_v62, %v1057_v61  ;;  %v1763_v62 = vld [vmem:[%s2857_s4 + $0x110] sm:$0xff] }
 0xc42   :  { %v2685_v7 = vsel %vm46_vm2, %v1064_v23, %v1059_v6  ;;  %v2145_v61 = vpack.c.bf16 %v1764_v63, %v1763_v62 }
 0xc43   :  { %v1039_v8 = vsel %vm59_vm3, %v2543_v35, %v1037_v4  ;;  %v1174_v16 = vrot.slane %v2685_v7, 2  ;;  %v1267_v19 = vrot.slane %v2685_v7, 4  ;;  %v1360_v24 = vrot.slane %v2685_v7, 6  ;;  %v1765_v4 = vld [vmem:[%s2857_s4 + $0x120] sm:$0xff] }
 0xc44   :  { %v1060_v12 = vsel %vm42_vm0, %v1039_v8, %v1042_v9  ;;  %v2149_v6 = vpack.c.bf16 %v1766_v5, %v1765_v4  ;;  %v1767_v8 = vld [vmem:[%s2857_s4 + $0x130] sm:$0xff]  ;;  %v1768_v9 = vld [vmem:[%s2857_s4 + $0x138] sm:$0xff] }
 0xc45   :  { %v1061_v35 = vsel %vm44_vm1, %v1060_v12, %v1045_v25  ;;  %v1363_v2 = vsel %vm42_vm0, %v1360_v24, %v1362_v58  ;;  %v2153_v10 = vpack.c.bf16 %v1768_v9, %v1767_v8  ;;  %v2304_v12 = vmov 0.0|0.0  }
 0xc46   :  { %v1062_v3 = vsel %vm46_vm2, %v1061_v35, %v1048_v15  ;;  %2157 = vmatprep.subr.bf16.mxu0 %v2304_v12  ;;  %v1606_v15 = vld [vmem:[%s2859_s6 + $0x10] sm:$0xff]  ;;  %v1607_v35 = vld [vmem:[%s2859_s6 + $0x18] sm:$0xff] }
 0xc47   :  { %1843 = vmatprep.mubr.msk.f32.mxu1 %vm90_vm4, %v1062_v3  ;;  %v1173_v21 = vrot.slane %v1062_v3, 2  ;;  %v1266_v22 = vrot.slane %v1062_v3, 4  ;;  %v1359_v23 = vrot.slane %v1062_v3, 6  ;;  %v2161_v3 = vpack.c.bf16 %v1607_v35, %v1606_v15 }
 0xc48   :  { %1844 = vmatmul.mubr.msk.f32.vlgmr.msra.gmra.mrb[4].mxu1 %vm90_vm4, %v2685_v7 }
 0xc49   :  { %2096 = vmatpush3.bf16.msra.mxu1 %v2093_v52  ;;  %v1175_v26 = vsel %vm46_vm2, %v1173_v21, %v1174_v16  ;;  %v1268_v27 = vsel %vm44_vm1, %v1266_v22, %v1267_v19  ;;  %v1361_v28 = vsel %vm42_vm0, %v1359_v23, %v1360_v24  ;;  %v2133_v52 = vpack.c.bf16 %v1756_v49, %v1755_v48  ;;  %v1728_v22 = vld [vmem:[%s2858_s5] ss:$0 sm:$0xff] }
 0xc4a   :  { %1862 = vmatprep.mubr.msk.f32.mxu1 %vm90_vm4, %v1175_v26  ;;  %2098 = vmatprep.subr.bf16.mxu1 %v2097_v17  ;;  %v2307_v23 = vmov 0  }
 0xc4d   :  { %2100 = vmatpush3.bf16.msra.mxu1 %v2097_v17  ;;  %v2306_v17 = vmov 1983009808  }
 0xc4e   :  { %2102 = vmatprep.subr.bf16.mxu1 %v2101_v29 }
 0xc51   :  { %2104 = vmatpush3.bf16.msra.mxu1 %v2101_v29 }
 0xc52   :  { %2106 = vmatprep.subr.bf16.mxu1 %v2105_v44 }
 0xc55   :  { %2108 = vmatpush3.bf16.msra.mxu1 %v2105_v44 }
 0xc56   :  { %2110 = vmatprep.subr.bf16.mxu1 %v2109_v51 }
 0xc58   :  { %1863 = vmatmul.mubr.msk.f32.vlgmr.msra.gmra.mrb[4].mxu1 %vm90_vm4, %v1174_v16  ;;  %v1565_v16 = vand.u32 127, %v80_v0 }
 0xc59   :  { %2112 = vmatpush3.bf16.msra.mxu1 %v2109_v51  ;;  %1881 = vmatprep.mubr.msk.f32.mxu1 %vm90_vm4, %v1268_v27 }
 0xc5a   :  { %2114 = vmatprep.subr.bf16.mxu1 %v2113_v13  ;;  %vm1567_vm6 = vcmp.lt.s32.totalorder %v1565_v16, 16  ;;  %vm1570_vm7 = vcmp.ge.s32.totalorder %v1565_v16, 16  ;;  %vm1571_vm8 = vcmp.lt.s32.totalorder %v1565_v16, 32 }
 0xc5b   :  { %v1569_v31 = vsel %vm1567_vm6, 6, %v2307_v23  ;;  %vm1572_vm9 = vmand %vm1570_vm7, %vm1571_vm8 }
 0xc5c   :  { %v1573_v26 = vsel %vm1572_vm9, 4, %v1569_v31 }
 0xc5d   :  { %2116 = vmatpush3.bf16.msra.mxu1 %v2113_v13  ;;  %vm1578_vm10 = vcmp.gt.s32.totalorder %v1573_v26, 4  ;;  %vm1579_vm11 = vcmp.gt.s32.totalorder %v1573_v26, 5  ;;  %vm1574_vm13 = vcmp.gt.s32.totalorder %v1573_v26, 0  ;;  %vm1575_vm14 = vcmp.gt.s32.totalorder %v1573_v26, 1 }
 0xc5e   :  { %2118 = vmatprep.subr.bf16.mxu1 %v2117_v34  ;;  %vm1576_vm15 = vcmp.gt.s32.totalorder %v1573_v26, 2  ;;  %vm1577_vm0 = vcmp.gt.s32.totalorder %v1573_v26, 3 }
 0xc61   :  { %2120 = vmatpush3.bf16.msra.mxu1 %v2117_v34 }
 0xc62   :  { %2122 = vmatprep.subr.bf16.mxu1 %v2121_v37 }
 0xc65   :  { %2124 = vmatpush3.bf16.msra.mxu1 %v2121_v37 }
 0xc66   :  { %2126 = vmatprep.subr.bf16.mxu1 %v2125_v41 }
 0xc68   :  { %1882 = vmatmul.mubr.msk.f32.vlgmr.msra.gmra.mrb[4].mxu1 %vm90_vm4, %v1267_v19  ;;  %v1535_v19 = vunpack.c.l.s4 %v2306_v17 }
 0xc69   :  { %2128 = vmatpush3.bf16.msra.mxu1 %v2125_v41  ;;  %1900 = vmatprep.mubr.msk.f32.mxu1 %vm90_vm4, %v1361_v28 }
 0xc6a   :  { %2130 = vmatprep.subr.bf16.mxu1 %v2129_v47  ;;  %v1536_v21 = vunpack.c.0.s8 %v1535_v19 }
 0xc6c   :  { %v1539_v59 = vsub.s32 %v1536_v21, %v2525_v1 }
 0xc6d   :  { %2132 = vmatpush3.bf16.msra.mxu1 %v2129_v47 }
 0xc6e   :  { %2134 = vmatprep.subr.bf16.mxu1 %v2133_v52 }
 0xc71   :  { %2136 = vmatpush3.bf16.msra.mxu1 %v2133_v52 }
 0xc72   :  { %2138 = vmatprep.subr.bf16.mxu1 %v2137_v14 }
 0xc75   :  { %2140 = vmatpush3.bf16.msra.mxu1 %v2137_v14 }
 0xc76   :  { %2142 = vmatprep.subr.bf16.mxu1 %v2141_v20 }
 0xc78   :  { %1901 = vmatmul.mubr.msk.f32.vlgmr.msra.gmra.mrb[4].mxu1 %vm90_vm4, %v1363_v2 }
 0xc79   :  { %2144 = vmatpush3.bf16.msra.mxu1 %v2141_v20  ;;  %1919 = vmatprep.mubr.msk.f32.mxu1 %vm90_vm4, %v2685_v7  ;;  %v1604_v7 = vld [vmem:[%s2859_s6] sm:$0xff] }
 0xc7a   :  { %2146 = vmatprep.subr.bf16.mxu1 %v2145_v61  ;;  %v2158_v25 = vpack.c.bf16 %v1605_v45, %v1604_v7 }
 0xc7c   :  { %2159 = vmatpush3.bf16.msra.mxu0 %v2158_v25 }
 0xc7d   :  { %2148 = vmatpush3.bf16.msra.mxu1 %v2145_v61  ;;  %2160 = vmatprep.subr.bf16.mxu0 %v2304_v12 }
 0xc7e   :  { %2150 = vmatprep.subr.bf16.mxu1 %v2149_v6 }
 0xc80   :  { %2162 = vmatpush3.bf16.msra.mxu0 %v2161_v3 }
 0xc81   :  { %2152 = vmatpush3.bf16.msra.mxu1 %v2149_v6 }
 0xc82   :  { %2154 = vmatprep.subr.bf16.mxu1 %v2153_v10 }
 0xc85   :  { %2156 = vmatpush3.bf16.msra.mxu1 %v2153_v10 }
 0xc88   :  { %1920 = vmatmul.mubr.f32.vlgmr.msra.gmra.mrb[4].mxu1 %v2301_v18 }
 0xd5b   :  { %v1921_v24 = vpop.f32.mrb[4].mxu1 }
 0xd5c   :  { %v2163_v18 = vadd.f32 %v1921_v24, %v1728_v22  ;;  %v1520_v27 = vpop.f32.mrb[5].mxu1 }
 0xd5d   :  { %v2164_v0 = vadd.f32 %v1728_v22, %v1520_v27 }
 0xd5e   :  { %v1556_v28 = vrot.slane %v2163_v18, %v1539_v59 }
 0xd5f   :  { %v1533_v29 = vcombine.high %v2164_v0, %v2164_v0  ;;  %v1540_v43 = vrot.slane %v2164_v0, %v1539_v59 }
 0xd60   :  { %v1557_v30 = vcombine.high %v1556_v28, %v1556_v28  ;;  %v1584_v44 = vmax.f32 %v1556_v28, 0.0 }
 0xd61   :  { %v1547_v32 = vrot.slane %v1533_v29, %v1539_v59  ;;  %v1548_v50 = vcombine.high %v1540_v43, %v1540_v43  ;;  %v1580_v51 = vmax.f32 %v1540_v43, 0.0 }
 0xd62   :  { %v1585_v56 = vmax.f32 %v1557_v30, 0.0  ;;  %v1590_v11 = vsel %vm1578_vm10, %v1584_v44, 0.0 }
 0xd63   :  { %v1549_v1 = vcombine.high %v1547_v32, %v1547_v32  ;;  %v1581_v13 = vmax.f32 %v1548_v50, 0.0  ;;  %v1582_v33 = vmax.f32 %v1547_v32, 0.0  ;;  %v1597_v34 = vsel %vm1592_vm12, %v1590_v11, -inf }
 0xd64   :  { %v1591_v57 = vsel %vm1579_vm11, %v1585_v56, 0.0  ;;  %v1586_v60 = vsel %vm1574_vm13, %v1580_v51, 0.0 }
 0xd65   :  { %v1599_v36 = vsel %vm1592_vm12, %v1591_v57, -inf  ;;  %v1583_v37 = vmax.f32 %v1549_v1, 0.0  ;;  %v1587_v38 = vsel %vm1575_vm14, %v1581_v13, 0.0  ;;  %v1588_v40 = vsel %vm1576_vm15, %v1582_v33, 0.0 }
 0xd66   :  { %v1593_v41 = vsel %vm1592_vm12, %v1586_v60, -inf  ;;  %v1594_v42 = vsel %vm1592_vm12, %v1587_v38, -inf  ;;  %v1595_v49 = vsel %vm1592_vm12, %v1588_v40, -inf }
 0xd67   :  { %v1589_v46 = vsel %vm1577_vm0, %v1583_v37, 0.0  ;;  %v1598_v47 = vmax.f32 %v1593_v41, %v1597_v34  ;;  %v1600_v48 = vmax.f32 %v1594_v42, %v1599_v36 }
 0xd68   :  { %v1596_v52 = vsel %vm1592_vm12, %v1589_v46, -inf }
 0xd69   :  { %v1601_v39 = vmax.f32 %v1598_v47, %v1600_v48  ;;  %v1602_v53 = vmax.f32 %v1595_v49, %v1596_v52 }
 0xd6b   :  { %v1603_v14 = vmax.f32 %v1601_v39, %v1602_v53 }
 0xd6d   :  { %1931 = vmatmul.mubr.msk.f32.vlgmr.msra.gmra.mrb[16].mxu0 %vm59_vm3, %v1603_v14 }
 0xe40   :  { %v1684_v55 = vpop.f32.mrb[16].mxu0 }
 0xe41   :  { %v1685_v20 = vadd.f32 %v1770_v54, %v1684_v55  ;;  %v1932_v58 = vpop.f32.mrb[17].mxu0 }
 0xe43   :  { %1688 = vst.msk [vmem:[#allocation2] sm:$0x3] %vm1592_vm12, %v1685_v20 }
 0xe44   :  { %2288 = shalt.err (!%p2285_p4)
}
 0xe45   :  { %s2289_s19 = scalar_lea.hbm %s2861_s8, 32 }
 0xe46   :  { %p2290_p5 = scmp.ne.s32.totalorder %s2861_s8, %s2289_s19  ;;  %p2293_p6 = scmp.lt.u32.totalorder %s2289_s19, %s2861_s8 }
 0xe48   :  { %p2295_p7 = pnand %p2293_p6, %p2290_p5 }
 0xe4a   :  { %2298 = shalt.err (!%p2295_p7)
}
 0xe4b   :  { %1698 = dma.vmem_to_hbm [thread:$0]  %s1696_s15, 32, %s2861_s8, [#allocation3]  }
 0xe4c   :  { %2299 = dma.done.wait [#allocation3], 32  }
 0xe4d   :  { %2300 = vsyncadd [#allocation3], 4294967264 }
 0xe4e   :  { %1702 = vsyncpa [#allocation3], 1 }

</bundles_post_ra>
